<compile_context>
chip_gen: v5e
topology: v5e:2x2
jax: 0.10.0
libtpu: 0.0.40
codegen_flags: <defaults>
</compile_context>

<pallas_src>
import jax
import jax.numpy as jnp
from jax import lax
from jax.experimental import pallas as pl
from jax.experimental.pallas import tpu as pltpu


# ----------------------------------------------------------------------------
# Pallas kernel: fused Self_Attn forward for one image (channels-first).
# ----------------------------------------------------------------------------
def _make_self_attn_kernel(Ct):
    def kernel(x_ref, wqkv_ref, bqkv_ref, wo_ref, bo_ref, gamma_ref, y_ref):
        """
        x_ref    : (C, N) f32   -- channels on sublanes, pixels (N = H*W) on the lane axis
        wqkv_ref : (3*Ct+8, C) bf16   fused [Wq; Wk; Wv; 0] 1x1-conv weights
        bqkv_ref : (3*Ct+8, 1) f32    fused [bq; bk; bv; 1] biases
        wo_ref   : (C, Ct) bf16,  bo_ref: (C, 1) f32
        gamma_ref: (1,) f32 scalar in SMEM
        y_ref    : (C, N) f32
        """
        xb = x_ref[...].astype(jnp.bfloat16)

        # Fused q|k|v (+ones) projection: one MXU pass at full contraction depth K = C.
        qkv = jnp.dot(wqkv_ref[...], xb,
                      preferred_element_type=jnp.float32) + bqkv_ref[...]      # (3Ct+8, N)
        q = qkv[0:Ct]                       # (Ct, N)
        k = qkv[Ct:2 * Ct]                  # (Ct, N)
        v_aug = qkv[2 * Ct:]                # (Ct+8, N); trailing rows are exactly 1.0

        # Scores built transposed so torch's softmax(dim=1) becomes a lane-axis softmax:
        #   sT[j, i] = s[i, j] = sum_d q[d, i] * k[d, j] = (k^T @ q)[j, i]
        # k is only (Ct, N), so its transpose is a cheap in-VMEM relayout.
        kT = jnp.transpose(k).astype(jnp.bfloat16)                             # (N, Ct)
        sT = jnp.dot(kT, q.astype(jnp.bfloat16),
                     preferred_element_type=jnp.float32)                       # (N_j, N_i)

        # Softmax numerator only (normalization deferred): max-subtract, exp, and a single
        # f32 -> bf16 materialization of the (N, N) matrix.  No divides here.
        m = jnp.max(sT, axis=-1, keepdims=True)
        p = jnp.exp(sT - m).astype(jnp.bfloat16)                               # (N_j, N_i)

        # Unnormalized P @ V.  The ones-rows of v_aug make this same MXU pass emit the
        # softmax denominators l[j] = sum_i p[j, i] (>= 1, so no divide-by-zero), already
        # laid out as a (1, N) row.
        u_aug = lax.dot_general(v_aug.astype(jnp.bfloat16), p,
                                dimension_numbers=(((1,), (1,)), ((), ())),
                                preferred_element_type=jnp.float32)            # (Ct+8, N_j)
        u = u_aug[0:Ct]                                                        # (Ct, N_j)
        l = u_aug[Ct:Ct + 1]                                                   # (1,  N_j)
        un = u * pl.reciprocal(l, approx=True)          # deferred normalization, EUP recip

        # Output 1x1 conv back to C channels + residual: one lane-dense (C, N) store.
        o = jnp.dot(wo_ref[...], un.astype(jnp.bfloat16),
                    preferred_element_type=jnp.float32) + bo_ref[...]          # (C, N)
        y_ref[...] = gamma_ref[0] * o + x_ref[...]

    return kernel


# ----------------------------------------------------------------------------
# One-time parameter prep: fuse q|k|v weights (+ the denominator ones-rows).
# ----------------------------------------------------------------------------
def fuse_params(params):
    """Torch-layout params in -> fused kernel operands out (do this once, outside jit)."""
    Ct, C = params["wq"].shape
    pad = 8  # zero-weight / bias=1 rows: the P@V matmul then also emits the softmax denominators
    wqkv = jnp.concatenate(
        [params["wq"], params["wk"], params["wv"], jnp.zeros((pad, C), jnp.float32)],
        axis=0).astype(jnp.bfloat16)                                     # (3*Ct+pad, C)
    bqkv = jnp.concatenate(
        [params["bq"], params["bk"], params["bv"], jnp.ones((pad,), jnp.float32)],
        axis=0).reshape(3 * Ct + pad, 1).astype(jnp.float32)             # (3*Ct+pad, 1)
    return {
        "wqkv": wqkv,
        "bqkv": bqkv,
        "wo": params["wo"].astype(jnp.bfloat16),                         # (C, Ct)
        "bo": params["bo"].reshape(C, 1).astype(jnp.float32),            # (C, 1)
        "gamma": params["gamma"].reshape(1).astype(jnp.float32),         # (1,) SMEM scalar
    }


# ----------------------------------------------------------------------------
# Wrapper: channels-first layout plumbing (all reshapes are free) + pallas_call.
# ----------------------------------------------------------------------------
def self_attn_forward(x_nchw, fused):
    """x_nchw: (B, C, H, W) f32. Returns y = gamma * o + x with shape (B, C, H, W)."""
    B, C, H, W = x_nchw.shape
    N = H * W
    Ct = fused["wo"].shape[1]
    R = fused["wqkv"].shape[0]            # 3*Ct + 8

    # Alignment expected by this single-block kernel (full arrays map onto (8,128) tiles).
    assert C % 8 == 0 and Ct % 8 == 0 and N % 128 == 0, (C, Ct, N)

    # NCHW -> (B, C, N) is torch's .flatten(2): a free reshape, no transpose, no HBM pass.
    x = x_nchw.reshape(B, C, N).astype(jnp.float32)

    kernel = _make_self_attn_kernel(Ct)

    flops = B * (2 * N * C * R            # fused q|k|v projection (+ ones rows)
                 + 2 * N * N * Ct         # scores
                 + 2 * N * N * (R - 2 * Ct)   # P@V + denominator rows
                 + 2 * N * Ct * C)        # output 1x1 conv
    transcendentals = B * (N * N + N)     # softmax exp + approx reciprocals
    bytes_accessed = (2 * B * C * N * 4              # x in, y out (f32)
                      + 2 * (R * C + C * Ct)         # bf16 weights
                      + 4 * (R + C + 1))             # f32 biases + gamma

    y = pl.pallas_call(
        kernel,
        out_shape=jax.ShapeDtypeStruct((B, C, N), jnp.float32),
        grid_spec=pltpu.PrefetchScalarGridSpec(
            num_scalar_prefetch=0,
            grid=(B,),
            in_specs=[
                pl.BlockSpec((None, C, N), lambda b: (b, 0, 0)),      # x: one image / step
                pl.BlockSpec((R, C), lambda b: (0, 0)),               # wqkv (resident)
                pl.BlockSpec((R, 1), lambda b: (0, 0)),               # bqkv
                pl.BlockSpec((C, Ct), lambda b: (0, 0)),              # wo
                pl.BlockSpec((C, 1), lambda b: (0, 0)),               # bo
                pl.BlockSpec(memory_space=pltpu.MemorySpace.SMEM),    # gamma scalar
            ],
            out_specs=pl.BlockSpec((None, C, N), lambda b: (b, 0, 0)),
        ),
        compiler_params=pltpu.CompilerParams(
            dimension_semantics=("parallel",),
            vmem_limit_bytes=32 * 1024 * 1024,    # explicit headroom; ~3 MB/step at N=256
        ),
        cost_estimate=pl.CostEstimate(
            flops=flops, transcendentals=transcendentals, bytes_accessed=bytes_accessed),
    )(x, fused["wqkv"], fused["bqkv"], fused["wo"], fused["bo"], fused["gamma"])

    # (B, C, N) -> NCHW: free reshape (inverse of flatten(2)).
    return y.reshape(B, C, H, W)


# ----------------------------------------------------------------------------
# Pure-JAX f32 reference (mirrors the PyTorch module op-for-op, torch weight layout).
# ----------------------------------------------------------------------------
def self_attn_reference(x_nchw, params):
    B, C, H, W = x_nchw.shape
    N = H * W
    xf = x_nchw.reshape(B, C, N).astype(jnp.float32)

    def conv1x1(inp, w, b):                           # w: (C_out, C_in); inp: (B, C_in, N)
        return jnp.einsum("dc,bcn->bdn", w, inp) + b[None, :, None]

    q = conv1x1(xf, params["wq"], params["bq"])       # (B, Ct, N)
    k = conv1x1(xf, params["wk"], params["bk"])
    v = conv1x1(xf, params["wv"], params["bv"])
    s = jnp.einsum("bdi,bdj->bij", q, k)              # (B, N, N)
    beta = jax.nn.softmax(s, axis=1)                  # torch nn.Softmax(dim=1)
    v_att = jnp.einsum("bdi,bij->bdj", v, beta)       # (B, Ct, N)
    o = conv1x1(v_att, params["wo"], params["bo"])    # (B, C, N)
    y = params["gamma"][0] * o + xf
    return y.reshape(B, C, H, W)


# ----------------------------------------------------------------------------
# Deterministic parameter construction (Conv2d 1x1 weights in torch (C_out, C_in) layout).
# ----------------------------------------------------------------------------
def make_params(key, in_dim, k=8):
    Ct = in_dim // k
    kq, kk, kv, ko, kb = jax.random.split(key, 5)
    bq, bk, bv, bo = jax.random.split(kb, 4)

    def conv_w(kk_, cout, cin, scale):
        # torch Conv2d(cin, cout, 1) weight is (cout, cin, 1, 1); stored squeezed.
        return scale * jax.random.normal(kk_, (cout, cin), jnp.float32) / jnp.sqrt(cin)

    return {
        # 0.5x scale on query/key keeps attention logits O(1): a non-trivial softmax while
        # the bf16 MXU path stays well within the reference-check tolerance.
        "wq": conv_w(kq, Ct, in_dim, 0.5), "bq": 0.1 * jax.random.normal(bq, (Ct,), jnp.float32),
        "wk": conv_w(kk, Ct, in_dim, 0.5), "bk": 0.1 * jax.random.normal(bk, (Ct,), jnp.float32),
        "wv": conv_w(kv, Ct, in_dim, 1.0), "bv": 0.1 * jax.random.normal(bv, (Ct,), jnp.float32),
        "wo": conv_w(ko, in_dim, Ct, 1.0), "bo": 0.1 * jax.random.normal(bo, (in_dim,), jnp.float32),
        # torch initializes gamma = 0 (y == x); nonzero so the attention path contributes here.
        "gamma": jnp.array([0.5], jnp.float32),
    }


# ----------------------------------------------------------------------------
if __name__ == "__main__":
    key = jax.random.PRNGKey(0)
    k_params, k_x = jax.random.split(key)

    B, C, H, W = 2, 256, 16, 16           # in_dim=256, k=8 -> C_tilde=32, N=H*W=256
    params = make_params(k_params, C, k=8)
    fused = fuse_params(params)           # one-time weight fusion (outside jit)
    x = jax.random.normal(k_x, (B, C, H, W), jnp.float32)

    fwd = jax.jit(self_attn_forward)
    y = fwd(x, fused)
    jax.block_until_ready(y)

    assert y.shape == (B, C, H, W), y.shape
    assert bool(jnp.all(jnp.isfinite(y)))

    # Compare against the pure-JAX f32 reference (kernel uses bf16 MXU operands and an
    # approximate EUP reciprocal, so allow a modest absolute tolerance).
    y_ref = jax.jit(self_attn_reference)(x, params)
    max_err = float(jnp.max(jnp.abs(y - y_ref)))
    assert max_err < 1e-1, max_err

    print("KERNEL_OK")
</pallas_src>

<mosaic_0001>
module attributes {stable_mosaic.version = 11 : i64} {
  func.func @kernel(%arg0: i32, %arg1: memref<1x256x256xf32, #tpu.memory_space<vmem>>, %arg2: memref<104x256xbf16, #tpu.memory_space<vmem>>, %arg3: memref<104x1xf32, #tpu.memory_space<vmem>>, %arg4: memref<256x32xbf16, #tpu.memory_space<vmem>>, %arg5: memref<256x1xf32, #tpu.memory_space<vmem>>, %arg6: memref<1xf32, #tpu.memory_space<smem>>, %arg7: memref<1x256x256xf32, #tpu.memory_space<vmem>>) attributes {dimension_semantics = [#tpu.dimension_semantics<parallel>], iteration_bounds = array<i64: 2>, scalar_prefetch = 0 : i64, scratch_operands = 0 : i64, tpu.core_type = #tpu.core_type<tc>, window_params = [{transform_indices = @transform_0, window_bounds = array<i64: 1, 256, 256>}, {pipeline_mode = #tpu.pipeline_mode<synchronous>, transform_indices = @transform_1, window_bounds = array<i64: 104, 256>}, {pipeline_mode = #tpu.pipeline_mode<synchronous>, transform_indices = @transform_2, window_bounds = array<i64: 104, 1>}, {pipeline_mode = #tpu.pipeline_mode<synchronous>, transform_indices = @transform_3, window_bounds = array<i64: 256, 32>}, {pipeline_mode = #tpu.pipeline_mode<synchronous>, transform_indices = @transform_4, window_bounds = array<i64: 256, 1>}, {transform_indices = @transform_5, window_bounds = array<i64: 1>}, {transform_indices = @transform_6, window_bounds = array<i64: 1, 256, 256>}]} {
    %c0 = arith.constant 0 : index
    %c0_0 = arith.constant 0 : index
    %c0_1 = arith.constant 0 : index
    %0 = vector.load %arg1[%c0, %c0_0, %c0_1] : memref<1x256x256xf32, #tpu.memory_space<vmem>>, vector<1x256x256xf32>
    %1 = vector.shape_cast %0 : vector<1x256x256xf32> to vector<256x256xf32>
    %2 = arith.truncf %1 : vector<256x256xf32> to vector<256x256xbf16>
    %c0_2 = arith.constant 0 : index
    %c0_3 = arith.constant 0 : index
    %3 = vector.load %arg2[%c0_2, %c0_3] : memref<104x256xbf16, #tpu.memory_space<vmem>>, vector<104x256xbf16>
    %cst = arith.constant dense<0.000000e+00> : vector<104x256xf32>
    %4 = tpu.matmul %3, %2, %cst {dimension_numbers = #tpu.dot_dimension_numbers<[1], [0], [0], [1], [0, 0, 1, 1], [], []>} : vector<104x256xbf16>, vector<256x256xbf16>, vector<104x256xf32> -> vector<104x256xf32>
    %c0_4 = arith.constant 0 : index
    %c0_5 = arith.constant 0 : index
    %5 = vector.load %arg3[%c0_4, %c0_5] : memref<104x1xf32, #tpu.memory_space<vmem>>, vector<104x1xf32>
    %6 = vector.broadcast %5 : vector<104x1xf32> to vector<104x256xf32>
    %7 = arith.addf %4, %6 : vector<104x256xf32>
    %8 = vector.extract_strided_slice %7 {offsets = [0, 0], sizes = [32, 256], strides = [1, 1]} : vector<104x256xf32> to vector<32x256xf32>
    %9 = vector.extract_strided_slice %7 {offsets = [32, 0], sizes = [32, 256], strides = [1, 1]} : vector<104x256xf32> to vector<32x256xf32>
    %10 = vector.extract_strided_slice %7 {offsets = [64, 0], sizes = [40, 256], strides = [1, 1]} : vector<104x256xf32> to vector<40x256xf32>
    %11 = tpu.transpose %9, [1, 0] : vector<32x256xf32> -> vector<256x32xf32>
    %12 = arith.truncf %11 : vector<256x32xf32> to vector<256x32xbf16>
    %13 = arith.truncf %8 : vector<32x256xf32> to vector<32x256xbf16>
    %cst_6 = arith.constant dense<0.000000e+00> : vector<256x256xf32>
    %14 = tpu.matmul %12, %13, %cst_6 {dimension_numbers = #tpu.dot_dimension_numbers<[1], [0], [0], [1], [0, 0, 1, 1], [], []>} : vector<256x32xbf16>, vector<32x256xbf16>, vector<256x256xf32> -> vector<256x256xf32>
    %cst_7 = arith.constant dense<0xFF800000> : vector<256xf32>
    %15 = vector.multi_reduction <maximumf>, %14, %cst_7 [1] : vector<256x256xf32> to vector<256xf32>
    %16 = vector.shape_cast %15 : vector<256xf32> to vector<256x1xf32>
    %17 = vector.broadcast %16 : vector<256x1xf32> to vector<256x256xf32>
    %18 = arith.subf %14, %17 : vector<256x256xf32>
    %19 = math.exp %18 : vector<256x256xf32>
    %20 = arith.truncf %19 : vector<256x256xf32> to vector<256x256xbf16>
    %21 = arith.truncf %10 : vector<40x256xf32> to vector<40x256xbf16>
    %cst_8 = arith.constant dense<0.000000e+00> : vector<40x256xf32>
    %22 = tpu.matmul %21, %20, %cst_8 {dimension_numbers = #tpu.dot_dimension_numbers<[1], [1], [0], [0], [0, 0, 1, 0], [], []>} : vector<40x256xbf16>, vector<256x256xbf16>, vector<40x256xf32> -> vector<40x256xf32>
    %23 = vector.extract_strided_slice %22 {offsets = [0, 0], sizes = [32, 256], strides = [1, 1]} : vector<40x256xf32> to vector<32x256xf32>
    %24 = vector.extract_strided_slice %22 {offsets = [32, 0], sizes = [1, 256], strides = [1, 1]} : vector<40x256xf32> to vector<1x256xf32>
    %25 = tpu.reciprocal %24 {approx = true} : vector<1x256xf32> -> vector<1x256xf32>
    %26 = vector.broadcast %25 : vector<1x256xf32> to vector<32x256xf32>
    %27 = arith.mulf %23, %26 : vector<32x256xf32>
    %c0_9 = arith.constant 0 : index
    %c0_10 = arith.constant 0 : index
    %28 = vector.load %arg4[%c0_9, %c0_10] : memref<256x32xbf16, #tpu.memory_space<vmem>>, vector<256x32xbf16>
    %29 = arith.truncf %27 : vector<32x256xf32> to vector<32x256xbf16>
    %cst_11 = arith.constant dense<0.000000e+00> : vector<256x256xf32>
    %30 = tpu.matmul %28, %29, %cst_11 {dimension_numbers = #tpu.dot_dimension_numbers<[1], [0], [0], [1], [0, 0, 1, 1], [], []>} : vector<256x32xbf16>, vector<32x256xbf16>, vector<256x256xf32> -> vector<256x256xf32>
    %c0_12 = arith.constant 0 : index
    %c0_13 = arith.constant 0 : index
    %31 = vector.load %arg5[%c0_12, %c0_13] : memref<256x1xf32, #tpu.memory_space<vmem>>, vector<256x1xf32>
    %32 = vector.broadcast %31 : vector<256x1xf32> to vector<256x256xf32>
    %33 = arith.addf %30, %32 : vector<256x256xf32>
    %c0_14 = arith.constant 0 : index
    %34 = memref.load %arg6[%c0_14] : memref<1xf32, #tpu.memory_space<smem>>
    %35 = vector.broadcast %34 : f32 to vector<256x256xf32>
    %36 = arith.mulf %35, %33 : vector<256x256xf32>
    %c0_15 = arith.constant 0 : index
    %c0_16 = arith.constant 0 : index
    %c0_17 = arith.constant 0 : index
    %37 = vector.load %arg1[%c0_15, %c0_16, %c0_17] : memref<1x256x256xf32, #tpu.memory_space<vmem>>, vector<1x256x256xf32>
    %38 = vector.shape_cast %37 : vector<1x256x256xf32> to vector<256x256xf32>
    %39 = arith.addf %36, %38 : vector<256x256xf32>
    %c0_18 = arith.constant 0 : index
    %c0_19 = arith.constant 0 : index
    %c0_20 = arith.constant 0 : index
    %40 = vector.load %arg7[%c0_18, %c0_19, %c0_20] : memref<1x256x256xf32, #tpu.memory_space<vmem>>, vector<1x256x256xf32>
    %41 = vector.shape_cast %40 : vector<1x256x256xf32> to vector<256x256xf32>
    %42 = vector.shape_cast %39 : vector<256x256xf32> to vector<1x256x256xf32>
    tpu.vector_store %arg7[%c0_18, %c0_19, %c0_20], %42 {strides = array<i32>} : memref<1x256x256xf32, #tpu.memory_space<vmem>>, vector<1x256x256xf32>,
    return
  }
  func.func @transform_0(%arg0: i32) -> (i32, i32, i32) {
    %c0_i32 = arith.constant 0 : i32
    %c0_i32_0 = arith.constant 0 : i32
    %c0_i32_1 = arith.constant 0 : i32
    return %arg0, %c0_i32, %c0_i32_0 : i32, i32, i32
  }
  func.func @transform_1(%arg0: i32) -> (i32, i32) {
    %c0_i32 = arith.constant 0 : i32
    %c0_i32_0 = arith.constant 0 : i32
    %c0_i32_1 = arith.constant 0 : i32
    return %c0_i32, %c0_i32_0 : i32, i32
  }
  func.func @transform_2(%arg0: i32) -> (i32, i32) {
    %c0_i32 = arith.constant 0 : i32
    %c0_i32_0 = arith.constant 0 : i32
    %c0_i32_1 = arith.constant 0 : i32
    return %c0_i32, %c0_i32_0 : i32, i32
  }
  func.func @transform_3(%arg0: i32) -> (i32, i32) {
    %c0_i32 = arith.constant 0 : i32
    %c0_i32_0 = arith.constant 0 : i32
    %c0_i32_1 = arith.constant 0 : i32
    return %c0_i32, %c0_i32_0 : i32, i32
  }
  func.func @transform_4(%arg0: i32) -> (i32, i32) {
    %c0_i32 = arith.constant 0 : i32
    %c0_i32_0 = arith.constant 0 : i32
    %c0_i32_1 = arith.constant 0 : i32
    return %c0_i32, %c0_i32_0 : i32, i32
  }
  func.func @transform_5(%arg0: i32) -> i32 {
    %c0_i32 = arith.constant 0 : i32
    %c0_i32_0 = arith.constant 0 : i32
    return %c0_i32 : i32
  }
  func.func @transform_6(%arg0: i32) -> (i32, i32, i32) {
    %c0_i32 = arith.constant 0 : i32
    %c0_i32_0 = arith.constant 0 : i32
    %c0_i32_1 = arith.constant 0 : i32
    return %arg0, %c0_i32, %c0_i32_0 : i32, i32, i32
  }
}

</mosaic_0001>

<bundles_post_ra>
// kernel: self_attn_forward.1
= control target key start
LH: loop header
LB: loop body
LE: loop exit
PB: predicated region body
PF: predicated region fallthrough
CT: control target
= control target key end

     0   :  { %s2677_s23 = smov 0   ;;  %s3707_s0 = inlined_call_operand.vmem [shape: f32[2,256,256], index: 0, kind: input, shape index: {}]   ;;  %s3708_s1 = inlined_call_operand.vmem [shape: bf16[104,256], index: 1, kind: input, shape index: {}]   ;;  %s3709_s2 = inlined_call_operand.vmem [shape: f32[104,1], index: 2, kind: input, shape index: {}]   ;;  %s3710_s3 = inlined_call_operand.vmem [shape: bf16[256,32], index: 3, kind: input, shape index: {}]   ;;  %s3711_s4 = inlined_call_operand.vmem [shape: f32[256,1], index: 4, kind: input, shape index: {}]   ;;  %s3712_s5 = inlined_call_operand.<no memory space> [shape: f32[1], index: 5, kind: input, shape index: {}]   ;;  %s3713_s6 = inlined_call_operand.vmem [shape: f32[2,256,256], index: 6, kind: output, shape index: {}]  }
   0x1   :  { %11 = sst [smem:[#allocation2]] %s3712_s5 }
   0x2 LB: > { %s2204_s24 = sadd.s32 4294967295, %s2636_s23   ;;  %p2208_p0 = scmp.ge.s32.totalorder %s2636_s23, 1  ;;  %s2636_s23 = sphi %s2677_s23, %s17_s23  }
   0x3   : > { %p213_p1 = scmp.lt.s32.totalorder %s2636_s23, 3 }
   0x5   : > { %p214_p2 = pnand %p2208_p0, %p213_p1 }
   0x7   : > { %217 = sbr.rel (%p214_p2) target bundleno = 1648 (0x670), region = 44 }
   0xc   : > { %p243_p3 = scmp.lt.s32.totalorder %s2204_s24, 1  ;;  %v367_v0 = vld [vmem:[%s3709_s2 + $0x20] sm:$0xff]  ;;  %v2638_v1 = vmov 0   ;;  %vm764_vm0 = vcmask 261120   ;;  %s1955_s13 = sld [smem:[#allocation2]] }
   0xd   : > { %2431 = vset.pattern.permute.xlu0 %v2638_v1  ;;  %2432 = vset.pattern.permute.xlu1 %v2638_v1 }
   0xe   : > { %s3759_s24 = smov (!%p243_p3, %s2204_s24), 1  ;;  %398 = vperm.xlu0 %2431, %v367_v0   ;;  %2433 = vset.pattern.permute.xlu2 %v2638_v1 }
   0xf   : > { %s2391_s26 = sshll.u32 %s3759_s24, 9 }
  0x10   : > { %s2696_s29 = scalar_lea.vmem %s3707_s0, %s2391_s26  ;;  %s3475_s18 = scalar_lea.vmem %s3713_s6, %s2391_s26 }
  0x11   : > { %v282_v2 = vld [vmem:[%s2696_s29 + $0xe0] sm:$0xff]  ;;  %v284_v3 = vld [vmem:[%s2696_s29 + $0xf0] sm:$0xff]  ;;  %v283_v7 = vld [vmem:[%s2696_s29 + $0xe8] sm:$0xff] }
  0x12   : > { %v314_v4 = vld [vmem:[%s2696_s29 + $0x1e0] sm:$0xff]  ;;  %v332_v5 = vpack.c.bf16 %v284_v3, %v282_v2  ;;  %v316_v6 = vld [vmem:[%s2696_s29 + $0x1f0] sm:$0xff]  ;;  %v285_v8 = vld [vmem:[%s2696_s29 + $0xf8] sm:$0xff] }
  0x13   : > { %v348_v9 = vpack.c.bf16 %v316_v6, %v314_v4  ;;  %v333_v10 = vpack.c.bf16 %v285_v8, %v283_v7  ;;  %v315_v11 = vld [vmem:[%s2696_s29 + $0x1e8] sm:$0xff]  ;;  %v317_v12 = vld [vmem:[%s2696_s29 + $0x1f8] sm:$0xff]  ;;  %v278_v13 = vld [vmem:[%s2696_s29 + $0xc0] sm:$0xff] }
  0x14   : > { %508 = vmatpush.bf16.msra.mxu0 %v332_v5  ;;  %v349_v14 = vpack.c.bf16 %v317_v12, %v315_v11  ;;  %v280_v15 = vld [vmem:[%s2696_s29 + $0xd0] sm:$0xff]  ;;  %v310_v16 = vld [vmem:[%s2696_s29 + $0x1c0] sm:$0xff]  ;;  %v279_v20 = vld [vmem:[%s2696_s29 + $0xc8] sm:$0xff] }
  0x15   : > { %v312_v17 = vld [vmem:[%s2696_s29 + $0x1d0] sm:$0xff]  ;;  %551 = vmatpush.bf16.msra.mxu1 %v348_v9  ;;  %594 = vmatpush.bf16.msra.mxu2 %v333_v10  ;;  %v330_v18 = vpack.c.bf16 %v280_v15, %v278_v13  ;;  %v281_v21 = vld [vmem:[%s2696_s29 + $0xd8] sm:$0xff]  ;;  %v311_v22 = vld [vmem:[%s2696_s29 + $0x1c8] sm:$0xff] }
  0x16   : > { %v346_v19 = vpack.c.bf16 %v312_v17, %v310_v16  ;;  %637 = vmatpush.bf16.msra.mxu3 %v349_v14  ;;  %v331_v23 = vpack.c.bf16 %v281_v21, %v279_v20  ;;  %v313_v24 = vld [vmem:[%s2696_s29 + $0x1d8] sm:$0xff]  ;;  %v274_v25 = vld [vmem:[%s2696_s29 + $0xa0] sm:$0xff]  ;;  %v276_v26 = vld [vmem:[%s2696_s29 + $0xb0] sm:$0xff] }
  0x17   : > { %v347_v27 = vpack.c.bf16 %v313_v24, %v311_v22  ;;  %v306_v28 = vld [vmem:[%s2696_s29 + $0x1a0] sm:$0xff]  ;;  %v308_v29 = vld [vmem:[%s2696_s29 + $0x1b0] sm:$0xff]  ;;  %v275_v30 = vld [vmem:[%s2696_s29 + $0xa8] sm:$0xff]  ;;  %v328_v31 = vpack.c.bf16 %v276_v26, %v274_v25 }
  0x18   : > { %509 = vmatpush.bf16.msra.mxu0 %v330_v18  ;;  %v277_v32 = vld [vmem:[%s2696_s29 + $0xb8] sm:$0xff]  ;;  %v307_v33 = vld [vmem:[%s2696_s29 + $0x1a8] sm:$0xff]  ;;  %v344_v35 = vpack.c.bf16 %v308_v29, %v306_v28  ;;  %v270_v37 = vld [vmem:[%s2696_s29 + $0x80] sm:$0xff] }
  0x19   : > { %v309_v34 = vld [vmem:[%s2696_s29 + $0x1b8] sm:$0xff]  ;;  %552 = vmatpush.bf16.msra.mxu1 %v346_v19  ;;  %595 = vmatpush.bf16.msra.mxu2 %v331_v23  ;;  %v329_v36 = vpack.c.bf16 %v277_v32, %v275_v30  ;;  %v272_v38 = vld [vmem:[%s2696_s29 + $0x90] sm:$0xff]  ;;  %v302_v39 = vld [vmem:[%s2696_s29 + $0x180] sm:$0xff] }
  0x1a   : > { %638 = vmatpush.bf16.msra.mxu3 %v347_v27  ;;  %v345_v40 = vpack.c.bf16 %v309_v34, %v307_v33  ;;  %v304_v41 = vld [vmem:[%s2696_s29 + $0x190] sm:$0xff]  ;;  %v271_v42 = vld [vmem:[%s2696_s29 + $0x88] sm:$0xff]  ;;  %v273_v43 = vld [vmem:[%s2696_s29 + $0x98] sm:$0xff]  ;;  %v326_v46 = vpack.c.bf16 %v272_v38, %v270_v37 }
  0x1b   : > { %v303_v44 = vld [vmem:[%s2696_s29 + $0x188] sm:$0xff]  ;;  %v305_v45 = vld [vmem:[%s2696_s29 + $0x198] sm:$0xff]  ;;  %v342_v47 = vpack.c.bf16 %v304_v41, %v302_v39  ;;  %v327_v48 = vpack.c.bf16 %v273_v43, %v271_v42  ;;  %v266_v49 = vld [vmem:[%s2696_s29 + $0x60] sm:$0xff] }
  0x1c   : > { %510 = vmatpush.bf16.msra.mxu0 %v328_v31  ;;  %v268_v50 = vld [vmem:[%s2696_s29 + $0x70] sm:$0xff]  ;;  %v298_v51 = vld [vmem:[%s2696_s29 + $0x160] sm:$0xff]  ;;  %v343_v52 = vpack.c.bf16 %v305_v45, %v303_v44  ;;  %v267_v54 = vld [vmem:[%s2696_s29 + $0x68] sm:$0xff] }
  0x1d   : > { %553 = vmatpush.bf16.msra.mxu1 %v344_v35  ;;  %596 = vmatpush.bf16.msra.mxu2 %v329_v36  ;;  %v300_v53 = vld [vmem:[%s2696_s29 + $0x170] sm:$0xff]  ;;  %v269_v55 = vld [vmem:[%s2696_s29 + $0x78] sm:$0xff]  ;;  %v299_v56 = vld [vmem:[%s2696_s29 + $0x168] sm:$0xff]  ;;  %v324_v58 = vpack.c.bf16 %v268_v50, %v266_v49 }
  0x1e   : > { %639 = vmatpush.bf16.msra.mxu3 %v345_v40  ;;  %v301_v57 = vld [vmem:[%s2696_s29 + $0x178] sm:$0xff]  ;;  %v340_v59 = vpack.c.bf16 %v300_v53, %v298_v51  ;;  %v325_v60 = vpack.c.bf16 %v269_v55, %v267_v54  ;;  %v262_v61 = vld [vmem:[%s2696_s29 + $0x40] sm:$0xff]  ;;  %v264_v62 = vld [vmem:[%s2696_s29 + $0x50] sm:$0xff] }
  0x1f   : > { %v294_v63 = vld [vmem:[%s2696_s29 + $0x140] sm:$0xff]  ;;  %v341_v0 = vpack.c.bf16 %v301_v57, %v299_v56  ;;  %v296_v1 = vld [vmem:[%s2696_s29 + $0x150] sm:$0xff]  ;;  %v263_v2 = vld [vmem:[%s2696_s29 + $0x48] sm:$0xff]  ;;  %v322_v6 = vpack.c.bf16 %v264_v62, %v262_v61 }
  0x20   : > { %511 = vmatpush.bf16.msra.mxu0 %v326_v46  ;;  %v265_v3 = vld [vmem:[%s2696_s29 + $0x58] sm:$0xff]  ;;  %v295_v4 = vld [vmem:[%s2696_s29 + $0x148] sm:$0xff]  ;;  %v338_v7 = vpack.c.bf16 %v296_v1, %v294_v63  ;;  %v258_v9 = vld [vmem:[%s2696_s29 + $0x20] sm:$0xff] }
  0x21   : > { %554 = vmatpush.bf16.msra.mxu1 %v342_v47  ;;  %597 = vmatpush.bf16.msra.mxu2 %v327_v48  ;;  %v297_v5 = vld [vmem:[%s2696_s29 + $0x158] sm:$0xff]  ;;  %v323_v8 = vpack.c.bf16 %v265_v3, %v263_v2  ;;  %v260_v10 = vld [vmem:[%s2696_s29 + $0x30] sm:$0xff]  ;;  %v290_v11 = vld [vmem:[%s2696_s29 + $0x120] sm:$0xff] }
  0x22   : > { %640 = vmatpush.bf16.msra.mxu3 %v343_v52  ;;  %v339_v12 = vpack.c.bf16 %v297_v5, %v295_v4  ;;  %v292_v13 = vld [vmem:[%s2696_s29 + $0x130] sm:$0xff]  ;;  %v259_v14 = vld [vmem:[%s2696_s29 + $0x28] sm:$0xff]  ;;  %v261_v15 = vld [vmem:[%s2696_s29 + $0x38] sm:$0xff]  ;;  %v320_v19 = vpack.c.bf16 %v260_v10, %v258_v9 }
  0x23   : > { %v291_v16 = vld [vmem:[%s2696_s29 + $0x128] sm:$0xff]  ;;  %v293_v17 = vld [vmem:[%s2696_s29 + $0x138] sm:$0xff]  ;;  %v369_v18 = vld [vmem:[%s3709_s2 + $0x30] sm:$0xff]  ;;  %v336_v21 = vpack.c.bf16 %v292_v13, %v290_v11  ;;  %v321_v22 = vpack.c.bf16 %v261_v15, %v259_v14 }
  0x24   : > { %512 = vmatpush.bf16.msra.mxu0 %v324_v58  ;;  %408 = vperm.xlu1 %2432, %v369_v18   ;;  %v368_v20 = vld [vmem:[%s3709_s2 + $0x28] sm:$0xff]  ;;  %v254_v23 = vld [vmem:[%s2696_s29] sm:$0xff]  ;;  %v256_v24 = vld [vmem:[%s2696_s29 + $0x10] sm:$0xff]  ;;  %v337_v26 = vpack.c.bf16 %v293_v17, %v291_v16 }
  0x25   : > { %555 = vmatpush.bf16.msra.mxu1 %v340_v59  ;;  %598 = vmatpush.bf16.msra.mxu2 %v325_v60  ;;  %v286_v25 = vld [vmem:[%s2696_s29 + $0x100] sm:$0xff]  ;;  %v288_v27 = vld [vmem:[%s2696_s29 + $0x110] sm:$0xff]  ;;  %v255_v28 = vld [vmem:[%s2696_s29 + $0x8] sm:$0xff]  ;;  %v318_v32 = vpack.c.bf16 %v256_v24, %v254_v23 }
  0x26   : > { %641 = vmatpush.bf16.msra.mxu3 %v341_v0  ;;  %v257_v29 = vld [vmem:[%s2696_s29 + $0x18] sm:$0xff]  ;;  %403 = vperm.xlu0 %2431, %v368_v20   ;;  %v287_v30 = vld [vmem:[%s2696_s29 + $0x108] sm:$0xff]  ;;  %v2215_v33 = vld [vmem:[%s3708_s1] sm:$0xf]  ;;  %v334_v35 = vpack.c.bf16 %v288_v27, %v286_v25 }
  0x27   : > { %v289_v31 = vld [vmem:[%s2696_s29 + $0x118] sm:$0xff]  ;;  %v2394_v34 = vld [vmem:[%s3708_s1 + $0x4] sm:$0xf0]  ;;  %v319_v36 = vpack.c.bf16 %v257_v29, %v255_v28  ;;  %v2393_v37 = vld [vmem:[%s3708_s1 + $0x4] sm:$0xf] }
  0x28   : > { %513 = vmatpush.bf16.msra.mxu0 %v322_v6  ;;  %v2217_v38 = vld [vmem:[%s3708_s1 + $0x8] sm:$0xf0]  ;;  %v370_v39 = vld [vmem:[%s3709_s2 + $0x38] sm:$0xff]  ;;  %v335_v40 = vpack.c.bf16 %v289_v31, %v287_v30  ;;  %v2216_v41 = vor.u32 %v2394_v34, %v2215_v33  ;;  %v363_v42 = vld [vmem:[%s3709_s2] sm:$0xff] }
  0x29   : > { %556 = vmatpush.bf16.msra.mxu1 %v338_v7  ;;  %599 = vmatpush.bf16.msra.mxu2 %v323_v8  ;;  %v2220_v43 = vor.u32 %v2393_v37, %v2217_v38  ;;  %v364_v44 = vld [vmem:[%s3709_s2 + $0x8] sm:$0xff]  ;;  %v2223_v45 = vld [vmem:[%s3708_s1 + $0x10] sm:$0xf]  ;;  %v2396_v46 = vld [vmem:[%s3708_s1 + $0x14] sm:$0xf0] }
  0x2a   : > { %642 = vmatpush.bf16.msra.mxu3 %v339_v12  ;;  %v2395_v47 = vld [vmem:[%s3708_s1 + $0x14] sm:$0xf]  ;;  %v2225_v48 = vld [vmem:[%s3708_s1 + $0x18] sm:$0xf0]  ;;  %v2224_v49 = vor.u32 %v2396_v46, %v2223_v45  ;;  %v2231_v53 = vld [vmem:[%s3708_s1 + $0x20] sm:$0xf] }
  0x2b   : > { %v2228_v50 = vor.u32 %v2395_v47, %v2225_v48  ;;  %v365_v51 = vld [vmem:[%s3709_s2 + $0x10] sm:$0xff]  ;;  %v366_v52 = vld [vmem:[%s3709_s2 + $0x18] sm:$0xff]  ;;  %v2398_v54 = vld [vmem:[%s3708_s1 + $0x24] sm:$0xf0] }
  0x2c   : > { %514 = vmatpush.bf16.msra.mxu0 %v320_v19  ;;  %413 = vperm.xlu1 %2432, %v370_v39   ;;  %v2397_v55 = vld [vmem:[%s3708_s1 + $0x24] sm:$0xf]  ;;  %v2233_v56 = vld [vmem:[%s3708_s1 + $0x28] sm:$0xf0]  ;;  %v2232_v57 = vor.u32 %v2398_v54, %v2231_v53  ;;  %v2239_v59 = vld [vmem:[%s3708_s1 + $0x30] sm:$0xf] }
  0x2d   : > { %557 = vmatpush.bf16.msra.mxu1 %v336_v21  ;;  %600 = vmatpush.bf16.msra.mxu2 %v321_v22  ;;  %v2236_v58 = vor.u32 %v2397_v55, %v2233_v56  ;;  %v2400_v60 = vld [vmem:[%s3708_s1 + $0x34] sm:$0xf0]  ;;  %v2399_v61 = vld [vmem:[%s3708_s1 + $0x34] sm:$0xf]  ;;  %v2241_v62 = vld [vmem:[%s3708_s1 + $0x38] sm:$0xf0] }
  0x2e   : > { %643 = vmatpush.bf16.msra.mxu3 %v337_v26  ;;  %378 = vperm.xlu0 %2431, %v363_v42   ;;  %v2240_v63 = vor.u32 %v2400_v60, %v2239_v59  ;;  %v2244_v0 = vor.u32 %v2399_v61, %v2241_v62  ;;  %v2247_v48 = vld [vmem:[%s3708_s1 + $0x40] sm:$0xf] }
  0x2f   : > { %388 = vperm.xlu2 %2433, %v365_v51  }
  0x30   : > { %515 = vmatpush.bf16.msra.mxu0 %v318_v32 }
  0x31   : > { %558 = vmatpush.bf16.msra.mxu1 %v334_v35  ;;  %601 = vmatpush.bf16.msra.mxu2 %v319_v36 }
  0x32   : > { %644 = vmatpush.bf16.msra.mxu3 %v335_v40 }
  0x33   : > { %516 = vmatmul.bf16.vlgmr.msra.gmra.mxu0 %v2216_v41 }
  0x34   : > { %559 = vmatmul.bf16.vlgmr.msra.gmra.mxu1 %v2220_v43  ;;  %602 = vmatmul.bf16.vlgmr.msra.gmra.mxu2 %v2216_v41 }
  0x35   : > { %645 = vmatmul.bf16.vlgmr.msra.gmra.mxu3 %v2220_v43  ;;  %383 = vperm.xlu1 %2432, %v364_v44  }
  0x37   : > { %393 = vperm.xlu2 %2433, %v366_v52   ;;  %v2249_v52 = vld [vmem:[%s3708_s1 + $0x48] sm:$0xf0] }
  0x43   : > { %521 = vmatmul.bf16.gmra.mxu0 %v2224_v49 }
  0x44   : > { %564 = vmatmul.bf16.gmra.mxu1 %v2228_v50  ;;  %607 = vmatmul.bf16.gmra.mxu2 %v2224_v49  ;;  %v2402_v49 = vld [vmem:[%s3708_s1 + $0x44] sm:$0xf0] }
  0x45   : > { %650 = vmatmul.bf16.gmra.mxu3 %v2228_v50  ;;  %v2401_v50 = vld [vmem:[%s3708_s1 + $0x44] sm:$0xf]  ;;  %v2248_v51 = vor.u32 %v2402_v49, %v2247_v48 }
  0x46   : > { %v2252_v53 = vor.u32 %v2401_v50, %v2249_v52 }
  0x53   : > { %526 = vmatmul.bf16.gmra.mxu0 %v2232_v57 }
  0x54   : > { %569 = vmatmul.bf16.gmra.mxu1 %v2236_v58  ;;  %612 = vmatmul.bf16.gmra.mxu2 %v2232_v57 }
  0x55   : > { %655 = vmatmul.bf16.gmra.mxu3 %v2236_v58 }
  0x63   : > { %531 = vmatmul.bf16.gmra.mxu0 %v2240_v63 }
  0x64   : > { %574 = vmatmul.bf16.gmra.mxu1 %v2244_v0  ;;  %617 = vmatmul.bf16.gmra.mxu2 %v2240_v63 }
  0x65   : > { %660 = vmatmul.bf16.gmra.mxu3 %v2244_v0 }
  0x73   : > { %536 = vmatmul.bf16.gmra.mxu0 %v2248_v51 }
  0x74   : > { %622 = vmatmul.bf16.gmra.mxu2 %v2248_v51  ;;  %579 = vmatmul.bf16.gmra.mxu1 %v2252_v53 }
  0x75   : > { %665 = vmatmul.bf16.gmra.mxu3 %v2252_v53 }
  0x80   : > { %v399_v4 = vpop.permute.xlu0 %398 }
  0x89   : > { %v389_v10 = vpop.permute.xlu2 %388 }
  0x91   : > { %v394_v17 = vpop.permute.xlu2 %393 }
  0x96   : > { %v2831_v3 = vpop.permute.xlu1 %408 }
  0x98   : > { %v2835_v11 = vpop.permute.xlu0 %403 }
  0x9e   : > { %v2833_v9 = vpop.permute.xlu1 %413 }
  0xa0   : > { %v379_v18 = vpop.permute.xlu0 %378 }
  0xa7   : > { %v384_v16 = vpop.permute.xlu1 %383 }
  0xb0   : > { %v517_v1 = vpop.f32.mrf.mxu0 }
  0xb1   : > { %v560_v2 = vpop.f32.mrf.mxu1  ;;  %v518_v26 = vadd.f32 %v517_v1, %v379_v18 }
  0xb3   : > { %v561_v32 = vadd.f32 %v560_v2, %v518_v26 }
  0xb7   : > { %v603_v5 = vpop.f32.mrf.mxu2 }
  0xb8   : > { %v519_v6 = vpop.f32.mrf.mxu0  ;;  %v646_v7 = vpop.f32.mrf.mxu3  ;;  %v604_v34 = vadd.f32 %v603_v5, %v379_v18  ;;  %v2404_v5 = vld [vmem:[%s3708_s1 + $0x54] sm:$0xf0] }
  0xb9   : > { %v562_v8 = vpop.f32.mrf.mxu1  ;;  %v520_v23 = vadd.f32 %v519_v6, %v384_v16 }
  0xba   : > { %v647_v45 = vadd.f32 %v646_v7, %v604_v34 }
  0xbb   : > { %v563_v30 = vadd.f32 %v562_v8, %v520_v23  ;;  %v2403_v8 = vld [vmem:[%s3708_s1 + $0x54] sm:$0xf]  ;;  %v362_v23 = vld [vmem:[%s3708_s1 + $0x60] sm:$0xff] }
  0xbd   : > { %v760_v42 = vpack.c.bf16 %v563_v30, %v561_v32 }
  0xbf   : > { %v605_v12 = vpop.f32.mrf.mxu2 }
  0xc0   : > { %v522_v13 = vpop.f32.mrf.mxu0  ;;  %v648_v14 = vpop.f32.mrf.mxu3  ;;  %v606_v35 = vadd.f32 %v605_v12, %v384_v16 }
  0xc1   : > { %v565_v15 = vpop.f32.mrf.mxu1  ;;  %v523_v19 = vadd.f32 %v522_v13, %v389_v10 }
  0xc2   : > { %v649_v46 = vadd.f32 %v648_v14, %v606_v35 }
  0xc3   : > { %v566_v27 = vadd.f32 %v565_v15, %v523_v19 }
  0xc4   : > { %v761_v58 = vpack.c.bf16 %v649_v46, %v647_v45 }
  0xc7   : > { %v608_v20 = vpop.f32.mrf.mxu2 }
  0xc8   : > { %v524_v21 = vpop.f32.mrf.mxu0  ;;  %v651_v22 = vpop.f32.mrf.mxu3  ;;  %v609_v29 = vadd.f32 %v608_v20, %v389_v10  ;;  %v2257_v10 = vld [vmem:[%s3708_s1 + $0x58] sm:$0xf0] }
  0xc9   : > { %v525_v24 = vadd.f32 %v524_v21, %v394_v17  ;;  %v567_v25 = vpop.f32.mrf.mxu1  ;;  %v2260_v14 = vor.u32 %v2403_v8, %v2257_v10 }
  0xca   : > { %v652_v36 = vadd.f32 %v651_v22, %v609_v29 }
  0xcb   : > { %v568_v28 = vadd.f32 %v567_v25, %v525_v24  ;;  %584 = vmatmul.bf16.gmra.mxu1 %v2260_v14  ;;  %670 = vmatmul.bf16.gmra.mxu3 %v2260_v14  ;;  %v478_v25 = vunpack.c.l.b16 %v362_v23 }
  0xcd   : > { %v762_v31 = vpack.c.bf16 %v568_v28, %v566_v27  ;;  %v479_v27 = vunpack.c.h.b16 %v362_v23  ;;  %v492_v29 = vpack.c.b16 %v478_v25, %v478_v25 }
  0xcf   : > { %v610_v33 = vpop.f32.mrf.mxu2  ;;  %819 = vmatpush.bf16.msrb.mxu0 %v762_v31  ;;  %v493_v30 = vpack.c.b16 %v479_v27, %v479_v27 }
  0xd0   : > { %v611_v37 = vadd.f32 %v610_v33, %v394_v17  ;;  %v527_v38 = vpop.f32.mrf.mxu0  ;;  %v653_v39 = vpop.f32.mrf.mxu3 }
  0xd1   : > { %v528_v40 = vadd.f32 %v527_v38, %v399_v4  ;;  %v570_v41 = vpop.f32.mrf.mxu1 }
  0xd2   : > { %v654_v43 = vadd.f32 %v653_v39, %v611_v37 }
  0xd3   : > { %v571_v44 = vadd.f32 %v570_v41, %v528_v40  ;;  %820 = vmatpush.bf16.msrb.mxu0 %v760_v42 }
  0xd4   : > { %v763_v47 = vpack.c.bf16 %v654_v43, %v652_v36 }
  0xd5   : > { %680 = vxpose.xlu2.b32.start [1/4] (short) %v571_v44, 128 }
  0xd6   : > { %908 = vmatpush.bf16.msrb.mxu1 %v763_v47 }
  0xd7   : > { %v613_v54 = vpop.f32.mrf.mxu2 }
  0xd8   : > { %v614_v55 = vadd.f32 %v613_v54, %v399_v4  ;;  %v529_v56 = vpop.f32.mrf.mxu0  ;;  %v656_v57 = vpop.f32.mrf.mxu3  ;;  %v2255_v4 = vld [vmem:[%s3708_s1 + $0x50] sm:$0xf] }
  0xd9   : > { %v530_v59 = vadd.f32 %v529_v56, %v2835_v11  ;;  %v572_v60 = vpop.f32.mrf.mxu1  ;;  %v2256_v13 = vor.u32 %v2404_v5, %v2255_v4 }
  0xda   : > { %v657_v61 = vadd.f32 %v656_v57, %v614_v55  ;;  %909 = vmatpush.bf16.msrb.mxu1 %v761_v58 }
  0xdb   : > { %v573_v62 = vadd.f32 %v572_v60, %v530_v59  ;;  %541 = vmatmul.bf16.gmra.mxu0 %v2256_v13  ;;  %627 = vmatmul.bf16.gmra.mxu2 %v2256_v13 }
  0xdc   : > { %712 = vxpose.xlu0.b32.start [1/4] (short) %v657_v61, 128  ;;  %589 = vmatmul.bf16.gmra.mxu1 %v493_v30 }
  0xdd   : > { %681 = vxpose.xlu2.b32.cont [2/4] (short) %v573_v62, 128  ;;  %675 = vmatmul.bf16.gmra.mxu3 %v493_v30 }
  0xdf   : > { %v615_v63 = vpop.f32.mrf.mxu2 }
  0xe0   : > { %v616_v0 = vadd.f32 %v615_v63, %v2835_v11  ;;  %v532_v1 = vpop.f32.mrf.mxu0  ;;  %v658_v2 = vpop.f32.mrf.mxu3 }
  0xe1   : > { %v533_v6 = vadd.f32 %v532_v1, %v2831_v3  ;;  %v575_v7 = vpop.f32.mrf.mxu1 }
  0xe2   : > { %v659_v11 = vadd.f32 %v658_v2, %v616_v0 }
  0xe3   : > { %v576_v12 = vadd.f32 %v575_v7, %v533_v6 }
  0xe4   : > { %713 = vxpose.xlu0.b32.cont [2/4] (short) %v659_v11, 128 }
  0xe5   : > { %682 = vxpose.xlu2.b32.cont [3/4] (short) %v576_v12, 128 }
  0xe7   : > { %v618_v15 = vpop.f32.mrf.mxu2 }
  0xe8   : > { %v619_v16 = vadd.f32 %v618_v15, %v2831_v3  ;;  %v534_v17 = vpop.f32.mrf.mxu0  ;;  %v661_v18 = vpop.f32.mrf.mxu3 }
  0xe9   : > { %v535_v19 = vadd.f32 %v534_v17, %v2833_v9  ;;  %v577_v20 = vpop.f32.mrf.mxu1 }
  0xea   : > { %v662_v21 = vadd.f32 %v661_v18, %v619_v16 }
  0xeb   : > { %v578_v22 = vadd.f32 %v577_v20, %v535_v19  ;;  %546 = vmatmul.bf16.gmra.mxu0 %v492_v29  ;;  %632 = vmatmul.bf16.gmra.mxu2 %v492_v29 }
  0xec   : > { %714 = vxpose.xlu0.b32.cont [3/4] (short) %v662_v21, 128 }
  0xed   : > { %683 = vxpose.xlu2.b32.end [4/4] (short) %v578_v22, 128 }
  0xef   : > { %v620_v24 = vpop.f32.mrf.mxu2 }
  0xf0   : > { %v621_v26 = vadd.f32 %v620_v24, %v2833_v9  ;;  %v663_v3 = vpop.f32.mrf.mxu3  ;;  %v2876_v39 = vpop.f32.mrf.mxu0 }
  0xf1   : > { %3722 = vst [vmem:[#allocation3_spill] sm:$0xff] %v2876_v39  ;;  %v2878_v40 = vpop.f32.mrf.mxu1 }
  0xf2   : > { %v664_v28 = vadd.f32 %v663_v3, %v621_v26  ;;  %3723 = vst [vmem:[#allocation4_spill] sm:$0xff] %v2878_v40 }
  0xf4   : > { %715 = vxpose.xlu0.b32.end [4/4] (short) %v664_v28, 128 }
  0xf8   : > { %v2880_v42 = vpop.f32.mrf.mxu0 }
  0xf9   : > { %3724 = vst [vmem:[#allocation5_spill] sm:$0xff] %v2880_v42  ;;  %v2882_v43 = vpop.f32.mrf.mxu1 }
  0xfa   : > { %3725 = vst [vmem:[#allocation6_spill] sm:$0xff] %v2882_v43 }
 0x148   : > { %v2888_v47 = vpop.f32.mrf.mxu1 }
 0x149   : > { %3727 = vst [vmem:[#allocation8_spill] sm:$0xff] %v2888_v47 }
 0x150   : > { %v2892_v50 = vpop.f32.mrf.mxu1 }
 0x151   : > { %3729 = vst [vmem:[#allocation10_spill] sm:$0xff] %v2892_v50 }
 0x158   : > { %v2886_v46 = vpop.f32.mrf.mxu0 }
 0x159   : > { %3726 = vst [vmem:[#allocation7_spill] sm:$0xff] %v2886_v46  ;;  %v2898_v54 = vpop.f32.mrf.mxu1 }
 0x15a   : > { %3731 = vst [vmem:[#allocation12_spill] sm:$0xff] %v2898_v54 }
 0x160   : > { %v2890_v49 = vpop.f32.mrf.mxu0 }
 0x161   : > { %3728 = vst [vmem:[#allocation9_spill] sm:$0xff] %v2890_v49  ;;  %v592_v56 = vpop.f32.mrf.mxu1 }
 0x168   : > { %v2896_v53 = vpop.f32.mrf.mxu0 }
 0x169   : > { %3730 = vst [vmem:[#allocation11_spill] sm:$0xff] %v2896_v53 }
 0x16e   : > { %v696_v31 = vpop.trf.xlu2 }
 0x170   : > { %v549_v57 = vpop.f32.mrf.mxu0 }
 0x176   : > { %v697_v32 = vpop.trf.xlu2 }
 0x177   : > { %v744_v33 = vpack.c.bf16 %v697_v32, %v696_v31 }
 0x179   : > { %2261 = vmatmul.msk.bf16.vlgmr.msrb.gmra.mxu0 %vm764_vm0, %v744_v33  ;;  %2277 = vmatmul.msk.bf16.vlgmr.msrb.gmra.mxu1 %vm764_vm0, %v744_v33 }
 0x17e   : > { %v698_v34 = vpop.trf.xlu2 }
 0x180   : > { %v728_v61 = vpop.trf.xlu0 }
 0x186   : > { %v699_v9 = vpop.trf.xlu2 }
 0x187   : > { %v745_v35 = vpack.c.bf16 %v699_v9, %v698_v34 }
 0x188   : > { %v729_v0 = vpop.trf.xlu0 }
 0x189   : > { %2262 = vmatmul.msk.bf16.gmra.mxu0 %vm764_vm0, %v745_v35  ;;  %2278 = vmatmul.msk.bf16.gmra.mxu1 %vm764_vm0, %v745_v35  ;;  %v752_v10 = vpack.c.bf16 %v729_v0, %v728_v61 }
 0x18e   : > { %v700_v36 = vpop.trf.xlu2 }
 0x190   : > { %v730_v2 = vpop.trf.xlu0 }
 0x196   : > { %v701_v37 = vpop.trf.xlu2 }
 0x197   : > { %v746_v38 = vpack.c.bf16 %v701_v37, %v700_v36 }
 0x198   : > { %v731_v6 = vpop.trf.xlu0 }
 0x199   : > { %2263 = vmatmul.msk.bf16.gmra.mxu0 %vm764_vm0, %v746_v38  ;;  %2279 = vmatmul.msk.bf16.gmra.mxu1 %vm764_vm0, %v746_v38  ;;  %v753_v17 = vpack.c.bf16 %v731_v6, %v730_v2 }
 0x19e   : > { %v702_v41 = vpop.trf.xlu2 }
 0x1a0   : > { %v732_v11 = vpop.trf.xlu0 }
 0x1a6   : > { %v703_v44 = vpop.trf.xlu2 }
 0x1a7   : > { %v747_v45 = vpack.c.bf16 %v703_v44, %v702_v41 }
 0x1a8   : > { %v733_v14 = vpop.trf.xlu0 }
 0x1a9   : > { %2264 = vmatmul.msk.bf16.gmra.mxu0 %vm764_vm0, %v747_v45  ;;  %2280 = vmatmul.msk.bf16.gmra.mxu1 %vm764_vm0, %v747_v45  ;;  %v754_v23 = vpack.c.bf16 %v733_v14, %v732_v11 }
 0x1ae   : > { %v704_v48 = vpop.trf.xlu2 }
 0x1b0   : > { %v734_v18 = vpop.trf.xlu0 }
 0x1b6   : > { %v705_v51 = vpop.trf.xlu2 }
 0x1b7   : > { %v748_v52 = vpack.c.bf16 %v705_v51, %v704_v48 }
 0x1b8   : > { %v735_v24 = vpop.trf.xlu0 }
 0x1b9   : > { %2265 = vmatmul.msk.bf16.gmra.mxu0 %vm764_vm0, %v748_v52  ;;  %2281 = vmatmul.msk.bf16.gmra.mxu1 %vm764_vm0, %v748_v52  ;;  %v755_v29 = vpack.c.bf16 %v735_v24, %v734_v18 }
 0x1be   : > { %v706_v55 = vpop.trf.xlu2 }
 0x1c0   : > { %v736_v3 = vpop.trf.xlu0 }
 0x1c6   : > { %v707_v58 = vpop.trf.xlu2 }
 0x1c7   : > { %v749_v59 = vpack.c.bf16 %v707_v58, %v706_v55 }
 0x1c8   : > { %v737_v30 = vpop.trf.xlu0 }
 0x1c9   : > { %2266 = vmatmul.msk.bf16.gmra.mxu0 %vm764_vm0, %v749_v59  ;;  %2282 = vmatmul.msk.bf16.gmra.mxu1 %vm764_vm0, %v749_v59  ;;  %v756_v35 = vpack.c.bf16 %v737_v30, %v736_v3 }
 0x1ce   : > { %v708_v60 = vpop.trf.xlu2 }
 0x1d0   : > { %v738_v33 = vpop.trf.xlu0 }
 0x1d6   : > { %v709_v62 = vpop.trf.xlu2 }
 0x1d7   : > { %v750_v63 = vpack.c.bf16 %v709_v62, %v708_v60 }
 0x1d8   : > { %v739_v38 = vpop.trf.xlu0 }
 0x1d9   : > { %2267 = vmatmul.msk.bf16.gmra.mxu0 %vm764_vm0, %v750_v63  ;;  %2283 = vmatmul.msk.bf16.gmra.mxu1 %vm764_vm0, %v750_v63  ;;  %v757_v45 = vpack.c.bf16 %v739_v38, %v738_v33 }
 0x1de   : > { %v710_v1 = vpop.trf.xlu2 }
 0x1e0   : > { %v740_v48 = vpop.trf.xlu0 }
 0x1e6   : > { %v711_v4 = vpop.trf.xlu2 }
 0x1e7   : > { %v751_v5 = vpack.c.bf16 %v711_v4, %v710_v1 }
 0x1e8   : > { %v741_v55 = vpop.trf.xlu0 }
 0x1e9   : > { %2268 = vmatmul.msk.bf16.gmra.mxu0 %vm764_vm0, %v751_v5  ;;  %2284 = vmatmul.msk.bf16.gmra.mxu1 %vm764_vm0, %v751_v5  ;;  %v758_v56 = vpack.c.bf16 %v741_v55, %v740_v48  ;;  %v1461_v48 = vld [vmem:[%s3711_s4 + $0x20] sm:$0xff] }
 0x1f6   : > { %v2906_v7 = vpop.f32.mrf.mxu0  ;;  %v2908_v8 = vpop.f32.mrf.mxu1 }
 0x1f7   : > { %3732 = vst [vmem:[#allocation13_spill] sm:$0xff] %v2906_v7 }
 0x1f8   : > { %3733 = vst [vmem:[#allocation14_spill] sm:$0xff] %v2908_v8 }
 0x1f9   : > { %2269 = vmatmul.msk.bf16.gmra.mxu0 %vm764_vm0, %v752_v10  ;;  %2285 = vmatmul.msk.bf16.gmra.mxu1 %vm764_vm0, %v752_v10 }
 0x1fe   : > { %v2912_v12 = vpop.f32.mrf.mxu0  ;;  %v2914_v13 = vpop.f32.mrf.mxu1 }
 0x1ff   : > { %3734 = vst [vmem:[#allocation15_spill] sm:$0xff] %v2912_v12  ;;  %v994_v11 = vmax.f32 %v2912_v12, %v2914_v13 }
 0x200   : > { %3735 = vst [vmem:[#allocation16_spill] sm:$0xff] %v2914_v13 }
 0x206   : > { %v2916_v15 = vpop.f32.mrf.mxu0  ;;  %v2918_v16 = vpop.f32.mrf.mxu1 }
 0x209   : > { %2270 = vmatmul.msk.bf16.gmra.mxu0 %vm764_vm0, %v753_v17  ;;  %2286 = vmatmul.msk.bf16.gmra.mxu1 %vm764_vm0, %v753_v17 }
 0x20e   : > { %v2922_v19 = vpop.f32.mrf.mxu0  ;;  %v2924_v20 = vpop.f32.mrf.mxu1 }
 0x216   : > { %v2926_v21 = vpop.f32.mrf.mxu0  ;;  %v2928_v22 = vpop.f32.mrf.mxu1 }
 0x219   : > { %2271 = vmatmul.msk.bf16.gmra.mxu0 %vm764_vm0, %v754_v23  ;;  %2287 = vmatmul.msk.bf16.gmra.mxu1 %vm764_vm0, %v754_v23 }
 0x21e   : > { %v2932_v25 = vpop.f32.mrf.mxu0  ;;  %v2934_v26 = vpop.f32.mrf.mxu1 }
 0x226   : > { %v2936_v27 = vpop.f32.mrf.mxu0  ;;  %v2938_v28 = vpop.f32.mrf.mxu1 }
 0x229   : > { %2272 = vmatmul.msk.bf16.gmra.mxu0 %vm764_vm0, %v755_v29  ;;  %2288 = vmatmul.msk.bf16.gmra.mxu1 %vm764_vm0, %v755_v29  ;;  %v373_v29 = vld [vmem:[%s3709_s2 + $0x50] sm:$0xff] }
 0x22e   : > { %v2942_v31 = vpop.f32.mrf.mxu0  ;;  %v2944_v32 = vpop.f32.mrf.mxu1 }
 0x236   : > { %v2946_v34 = vpop.f32.mrf.mxu0  ;;  %v2948_v9 = vpop.f32.mrf.mxu1 }
 0x239   : > { %2273 = vmatmul.msk.bf16.gmra.mxu0 %vm764_vm0, %v756_v35  ;;  %2289 = vmatmul.msk.bf16.gmra.mxu1 %vm764_vm0, %v756_v35  ;;  %v1458_v35 = vld [vmem:[%s3711_s4 + $0x8] sm:$0xff] }
 0x23e   : > { %v2952_v36 = vpop.f32.mrf.mxu0  ;;  %v2954_v37 = vpop.f32.mrf.mxu1 }
 0x246   : > { %v2956_v41 = vpop.f32.mrf.mxu0  ;;  %v2958_v44 = vpop.f32.mrf.mxu1 }
 0x249   : > { %2274 = vmatmul.msk.bf16.gmra.mxu0 %vm764_vm0, %v757_v45  ;;  %2290 = vmatmul.msk.bf16.gmra.mxu1 %vm764_vm0, %v757_v45 }
 0x24e   : > { %v2962_v51 = vpop.f32.mrf.mxu0  ;;  %v2964_v52 = vpop.f32.mrf.mxu1 }
 0x256   : > { %v2966_v57 = vpop.f32.mrf.mxu0  ;;  %v2968_v58 = vpop.f32.mrf.mxu1 }
 0x257   : > { %v1027_v2 = vmax.f32 %v2966_v57, %v2968_v58 }
 0x259   : > { %2275 = vmatmul.msk.bf16.gmra.mxu0 %vm764_vm0, %v758_v56  ;;  %2291 = vmatmul.msk.bf16.gmra.mxu1 %vm764_vm0, %v758_v56 }
 0x25e   : > { %v2972_v59 = vpop.f32.mrf.mxu0  ;;  %v2974_v60 = vpop.f32.mrf.mxu1 }
 0x25f   : > { %v1030_v10 = vmax.f32 %v2972_v59, %v2974_v60 }
 0x266   : > { %v2976_v61 = vpop.f32.mrf.mxu0  ;;  %v2978_v62 = vpop.f32.mrf.mxu1 }
 0x267   : > { %v1033_v63 = vmax.f32 %v2976_v61, %v2978_v62 }
 0x269   : > { %1034 = vmax.xlane.f32.xlu1 %v1033_v63  ;;  %v1464_v63 = vld [vmem:[%s3711_s4 + $0x38] sm:$0xff] }
 0x26e   : > { %v2982_v0 = vpop.f32.mrf.mxu0  ;;  %v2984_v1 = vpop.f32.mrf.mxu1 }
 0x26f   : > { %v1036_v4 = vmax.f32 %v2982_v0, %v2984_v1 }
 0x271   : > { %1028 = vmax.xlane.f32.xlu1 %v1027_v2  ;;  %1037 = vmax.xlane.f32.xlu2 %v1036_v4  ;;  %v742_v2 = vpop.trf.xlu0 }
 0x276   : > { %v2990_v5 = vpop.f32.mrf.mxu0  ;;  %v2992_v6 = vpop.f32.mrf.mxu1 }
 0x279   : > { %1031 = vmax.xlane.f32.xlu1 %v1030_v10  ;;  %995 = vmax.xlane.f32.xlu2 %v994_v11  ;;  %v1467_v11 = vld [vmem:[%s3711_s4 + $0x50] sm:$0xff] }
 0x27e   : > { %v2998_v14 = vpop.f32.mrf.mxu0  ;;  %v3000_v17 = vpop.f32.mrf.mxu1 }
 0x27f   : > { %3736 = vst [vmem:[#allocation17_spill] sm:$0xff] %v2998_v14 }
 0x280   : > { %3737 = vst [vmem:[#allocation18_spill] sm:$0xff] %v3000_v17 }
 0x286   : > { %v3002_v18 = vpop.f32.mrf.mxu0  ;;  %v3004_v23 = vpop.f32.mrf.mxu1 }
 0x28e   : > { %v3006_v24 = vpop.f32.mrf.mxu0  ;;  %v3008_v3 = vpop.f32.mrf.mxu1 }
 0x291   : > { %428 = vperm.xlu2 %2433, %v373_v29   ;;  %v743_v29 = vpop.trf.xlu0 }
 0x296   : > { %v3013_v30 = vpop.f32.mrf.mxu0  ;;  %v3015_v33 = vpop.f32.mrf.mxu1 }
 0x299   : > { %1496 = vperm.xlu2 %2433, %v1458_v35   ;;  %v759_v35 = vpack.c.bf16 %v743_v29, %v742_v2  ;;  %v1473_v2 = vld [vmem:[%s3711_s4 + $0x80] sm:$0xff] }
 0x29b   : > { %2276 = vmatmul.msk.bf16.gmra.mxu0 %vm764_vm0, %v759_v35  ;;  %2292 = vmatmul.msk.bf16.gmra.mxu1 %vm764_vm0, %v759_v35  ;;  %v1476_v35 = vld [vmem:[%s3711_s4 + $0x98] sm:$0xff] }
 0x29e   : > { %v3020_v38 = vpop.f32.mrf.mxu0  ;;  %v3022_v45 = vpop.f32.mrf.mxu1 }
 0x2a1   : > { %1511 = vperm.xlu2 %2433, %v1461_v48  }
 0x2a6   : > { %v3027_v55 = vpop.f32.mrf.mxu0  ;;  %v3029_v56 = vpop.f32.mrf.mxu1 }
 0x2a9   : > { %1526 = vperm.xlu2 %2433, %v1464_v63   ;;  %v1470_v63 = vld [vmem:[%s3711_s4 + $0x68] sm:$0xff] }
 0x2ae   : > { %v3034_v4 = vpop.f32.mrf.mxu0  ;;  %v3036_v10 = vpop.f32.mrf.mxu1 }
 0x2b1   : > { %1541 = vperm.xlu2 %2433, %v1467_v11  }
 0x2b6   : > { %v3043_v48 = vpop.f32.mrf.mxu0  ;;  %v3045_v54 = vpop.f32.mrf.mxu1 }
 0x2b9   : > { %1556 = vperm.xlu2 %2433, %v1470_v63  }
 0x2be   : > { %v3050_v53 = vpop.f32.mrf.mxu0  ;;  %v3052_v47 = vpop.f32.mrf.mxu1 }
 0x2c1   : > { %1571 = vperm.xlu2 %2433, %v1473_v2   ;;  %v1479_v2 = vld [vmem:[%s3711_s4 + $0xb0] sm:$0xff] }
 0x2c6   : > { %v3057_v11 = vpop.f32.mrf.mxu0  ;;  %v3059_v29 = vpop.f32.mrf.mxu1 }
 0x2c7   : > { %v1069_v63 = vmax.f32 %v3057_v11, %v3059_v29 }
 0x2c9   : > { %1586 = vperm.xlu2 %2433, %v1476_v35   ;;  %1070 = vmax.xlane.f32.xlu1 %v1069_v63  ;;  %v1482_v35 = vld [vmem:[%s3711_s4 + $0xc8] sm:$0xff]  ;;  %v1021_v63 = vmax.f32 %v2956_v41, %v2958_v44 }
 0x2ce   : > { %v3066_v50 = vpop.f32.mrf.mxu0  ;;  %v3068_v46 = vpop.f32.mrf.mxu1 }
 0x2cf   : > { %v1072_v49 = vmax.f32 %v3066_v50, %v3068_v46 }
 0x2d1   : > { %1601 = vperm.xlu2 %2433, %v1479_v2   ;;  %1073 = vmax.xlane.f32.xlu1 %v1072_v49  ;;  %v1485_v49 = vld [vmem:[%s3711_s4 + $0xe0] sm:$0xff]  ;;  %v1024_v2 = vmax.f32 %v2962_v51, %v2964_v52 }
 0x2d6   : > { %v3075_v40 = vpop.f32.mrf.mxu0  ;;  %v3077_v43 = vpop.f32.mrf.mxu1 }
 0x2d7   : > { %3738 = vst [vmem:[#allocation19_spill] sm:$0xff] %v3075_v40  ;;  %v1075_v39 = vmax.f32 %v3075_v40, %v3077_v43  ;;  %v1488_v40 = vld [vmem:[%s3711_s4 + $0xf8] sm:$0xff] }
 0x2d8   : > { %3739 = vst [vmem:[#allocation20_spill] sm:$0xff] %v3077_v43 }
 0x2d9   : > { %1616 = vperm.xlu2 %2433, %v1482_v35   ;;  %1022 = vmax.xlane.f32.xlu1 %v1021_v63 }
 0x2da   : > { %1076 = vmax.xlane.f32.xlu0 %v1075_v39 }
 0x2dc   : > { %v1035_v42 = vpop.xlane.xlu1 %1034 }
 0x2dd   : > { %v1115_v13 = vsub.f32 %v2976_v61, %v1035_v42  ;;  %v1116_v12 = vsub.f32 %v2978_v62, %v1035_v42  ;;  %v1063_v61 = vmax.f32 %v3043_v48, %v3045_v54 }
 0x2df   : > { %v1207_v43 = vmul.f32 1.442695, %v1115_v13  ;;  %v1209_v63 = vmul.f32 1.442695, %v1116_v12 }
 0x2e1   : > { %1631 = vperm.xlu2 %2433, %v1485_v49   ;;  %1025 = vmax.xlane.f32.xlu1 %v1024_v2  ;;  %2434 = vpow2.f32 %v1207_v43 }
 0x2e2   : > { %2436 = vpow2.f32 %v1209_v63 }
 0x2e4   : > { %v1029_v7 = vpop.xlane.xlu1 %1028  ;;  %v1038_v8 = vpop.xlane.xlu2 %1037 }
 0x2e5   : > { %v1117_v35 = vsub.f32 %v2982_v0, %v1038_v8  ;;  %v1118_v39 = vsub.f32 %v2984_v1, %v1038_v8  ;;  %v1111_v14 = vsub.f32 %v2966_v57, %v1029_v7  ;;  %v1112_v42 = vsub.f32 %v2968_v58, %v1029_v7  ;;  %v372_v8 = vld [vmem:[%s3709_s2 + $0x48] sm:$0xff] }
 0x2e6   : > { %v1066_v58 = vmax.f32 %v3050_v53, %v3052_v47 }
 0x2e7   : > { %v1211_v17 = vmul.f32 1.442695, %v1117_v35  ;;  %v1213_v62 = vmul.f32 1.442695, %v1118_v39  ;;  %v1199_v13 = vmul.f32 1.442695, %v1111_v14  ;;  %v2435_v7 = vpop.eup %2434 }
 0x2e8   : > { %v1201_v12 = vmul.f32 1.442695, %v1112_v42  ;;  %v2437_v14 = vpop.eup %2436 }
 0x2e9   : > { %1646 = vperm.xlu2 %2433, %v1488_v40   ;;  %1064 = vmax.xlane.f32.xlu1 %v1063_v61  ;;  %2438 = vpow2.f32 %v1211_v17  ;;  %v1015_v61 = vmax.f32 %v2946_v34, %v2948_v9 }
 0x2ea   : > { %2440 = vpow2.f32 %v1213_v62 }
 0x2eb   : > { %2442 = vpow2.f32 %v1199_v13 }
 0x2ec   : > { %v1032_v57 = vpop.xlane.xlu1 %1031  ;;  %2444 = vpow2.f32 %v1201_v12  ;;  %v1018_v12 = vmax.f32 %v2952_v36, %v2954_v37 }
 0x2ed   : > { %v1113_v0 = vsub.f32 %v2972_v59, %v1032_v57  ;;  %v1114_v1 = vsub.f32 %v2974_v60, %v1032_v57  ;;  %v374_v59 = vld [vmem:[%s3709_s2 + $0x58] sm:$0xff] }
 0x2ee   : > { %423 = vperm.xlu0 %2431, %v372_v8   ;;  %v1457_v8 = vld [vmem:[%s3711_s4] sm:$0xff]  ;;  %v1460_v57 = vld [vmem:[%s3711_s4 + $0x18] sm:$0xff] }
 0x2ef   : > { %v1203_v43 = vmul.f32 1.442695, %v1113_v0  ;;  %v1205_v40 = vmul.f32 1.442695, %v1114_v1  ;;  %v2439_v17 = vpop.eup %2438  ;;  %v1057_v0 = vmax.f32 %v3027_v55, %v3029_v56  ;;  %v1463_v1 = vld [vmem:[%s3711_s4 + $0x30] sm:$0xff] }
 0x2f0   : > { %v2441_v49 = vpop.eup %2440  ;;  %v1293_v2 = vpack.c.bf16 %v2439_v17, %v2435_v7  ;;  %v1060_v7 = vmax.f32 %v3034_v4, %v3036_v10  ;;  %v1472_v17 = vld [vmem:[%s3711_s4 + $0x78] sm:$0xff] }
 0x2f1   : > { %2446 = vpow2.f32 %v1203_v43  ;;  %1067 = vmax.xlane.f32.xlu1 %v1066_v58  ;;  %v1294_v35 = vpack.c.bf16 %v2441_v49, %v2437_v14  ;;  %v2443_v60 = vpop.eup %2442  ;;  %v1466_v43 = vld [vmem:[%s3711_s4 + $0x48] sm:$0xff]  ;;  %v1469_v58 = vld [vmem:[%s3711_s4 + $0x60] sm:$0xff]  ;;  %v1012_v14 = vmax.f32 %v2942_v31, %v2944_v32  ;;  %v1051_v49 = vmax.f32 %v3013_v30, %v3015_v33 }
 0x2f2   : > { %2448 = vpow2.f32 %v1205_v40  ;;  %1317 = vmatpush.bf16.xpose.msra.mxu0 %v1293_v2  ;;  %v2445_v39 = vpop.eup %2444  ;;  %v1009_v40 = vmax.f32 %v2936_v27, %v2938_v28  ;;  %v1475_v2 = vld [vmem:[%s3711_s4 + $0x90] sm:$0xff] }
 0x2f3   : > { %1340 = vmatpush.bf16.xpose.msra.mxu1 %v1294_v35  ;;  %v1054_v35 = vmax.f32 %v3020_v38, %v3022_v45 }
 0x2f6   : > { %433 = vperm.xlu0 %2431, %v374_v59   ;;  %v1478_v59 = vld [vmem:[%s3711_s4 + $0xa8] sm:$0xff] }
 0x2f7   : > { %v2447_v63 = vpop.eup %2446 }
 0x2f8   : > { %v2449_v42 = vpop.eup %2448  ;;  %v1291_v62 = vpack.c.bf16 %v2447_v63, %v2443_v60  ;;  %v1003_v60 = vmax.f32 %v2926_v21, %v2928_v22 }
 0x2f9   : > { %1016 = vmax.xlane.f32.xlu1 %v1015_v61  ;;  %v1292_v13 = vpack.c.bf16 %v2449_v42, %v2445_v39  ;;  %v1481_v39 = vld [vmem:[%s3711_s4 + $0xc0] sm:$0xff]  ;;  %v1006_v42 = vmax.f32 %v2932_v25, %v2934_v26 }
 0x2fa   : > { %1318 = vmatpush.bf16.xpose.msra.mxu0 %v1291_v62 }
 0x2fb   : > { %1341 = vmatpush.bf16.xpose.msra.mxu1 %v1292_v13 }
 0x2fe   : > { %1491 = vperm.xlu0 %2431, %v1457_v8   ;;  %v1484_v8 = vld [vmem:[%s3711_s4 + $0xd8] sm:$0xff] }
 0x301   : > { %1019 = vmax.xlane.f32.xlu1 %v1018_v12 }
 0x306   : > { %1506 = vperm.xlu0 %2431, %v1460_v57  }
 0x309   : > { %1058 = vmax.xlane.f32.xlu1 %v1057_v0 }
 0x30e   : > { %1521 = vperm.xlu0 %2431, %v1463_v1  }
 0x311   : > { %1061 = vmax.xlane.f32.xlu1 %v1060_v7 }
 0x316   : > { %1536 = vperm.xlu0 %2431, %v1466_v43   ;;  %v1045_v43 = vmax.f32 %v3002_v18, %v3004_v23 }
 0x319   : > { %1010 = vmax.xlane.f32.xlu1 %v1009_v40 }
 0x31e   : > { %1551 = vperm.xlu0 %2431, %v1469_v58  }
 0x321   : > { %1013 = vmax.xlane.f32.xlu1 %v1012_v14 }
 0x326   : > { %1566 = vperm.xlu0 %2431, %v1472_v17   ;;  %v1048_v17 = vmax.f32 %v3006_v24, %v3008_v3 }
 0x329   : > { %1052 = vmax.xlane.f32.xlu1 %v1051_v49 }
 0x32e   : > { %1581 = vperm.xlu0 %2431, %v1475_v2  }
 0x331   : > { %1055 = vmax.xlane.f32.xlu1 %v1054_v35 }
 0x336   : > { %1596 = vperm.xlu0 %2431, %v1478_v59  }
 0x339   : > { %1004 = vmax.xlane.f32.xlu1 %v1003_v60 }
 0x33c   : > { %v1071_v63 = vpop.xlane.xlu1 %1070 }
 0x33d   : > { %v1139_v61 = vsub.f32 %v3057_v11, %v1071_v63  ;;  %v1140_v62 = vsub.f32 %v3059_v29, %v1071_v63  ;;  %v1487_v29 = vld [vmem:[%s3711_s4 + $0xf0] sm:$0xff] }
 0x33e   : > { %1611 = vperm.xlu0 %2431, %v1481_v39  }
 0x33f   : > { %v1255_v13 = vmul.f32 1.442695, %v1139_v61  ;;  %v1257_v12 = vmul.f32 1.442695, %v1140_v62 }
 0x341   : > { %1007 = vmax.xlane.f32.xlu1 %v1006_v42  ;;  %2450 = vpow2.f32 %v1255_v13  ;;  %v3189_v42 = vpop.f32.mrf.mxu0 }
 0x342   : > { %2452 = vpow2.f32 %v1257_v12 }
 0x344   : > { %v1074_v57 = vpop.xlane.xlu1 %1073 }
 0x345   : > { %v1141_v0 = vsub.f32 %v3066_v50, %v1074_v57  ;;  %v1142_v1 = vsub.f32 %v3068_v46, %v1074_v57 }
 0x346   : > { %1626 = vperm.xlu0 %2431, %v1484_v8   ;;  %v3193_v8 = vpop.f32.mrf.mxu1 }
 0x347   : > { %v1259_v11 = vmul.f32 1.442695, %v1141_v0  ;;  %v1261_v7 = vmul.f32 1.442695, %v1142_v1  ;;  %v3171_v58 = vpop.eup %2450  ;;  %v1078_v1 = vmax.f32 %v3189_v42, %v3193_v8 }
 0x348   : > { %v3173_v50 = vpop.eup %2452 }
 0x349   : > { %2454 = vpow2.f32 %v1259_v11  ;;  %1046 = vmax.xlane.f32.xlu1 %v1045_v43 }
 0x34a   : > { %2456 = vpow2.f32 %v1261_v7 }
 0x34c   : > { %v1023_v40 = vpop.xlane.xlu1 %1022 }
 0x34d   : > { %v1107_v14 = vsub.f32 %v2956_v41, %v1023_v40  ;;  %v1108_v2 = vsub.f32 %v2958_v44, %v1023_v40  ;;  %v997_v44 = vmax.f32 %v2916_v15, %v2918_v16 }
 0x34e   : > { %1641 = vperm.xlu0 %2431, %v1487_v29   ;;  %v3199_v29 = vpop.f32.mrf.mxu0 }
 0x34f   : > { %v3175_v46 = vpop.eup %2454  ;;  %v1191_v60 = vmul.f32 1.442695, %v1107_v14  ;;  %v1193_v39 = vmul.f32 1.442695, %v1108_v2  ;;  %v3201_v14 = vpop.f32.mrf.mxu1 }
 0x350   : > { %v3180_v49 = vpop.eup %2456  ;;  %v1305_v35 = vpack.c.bf16 %v3175_v46, %v3171_v58 }
 0x351   : > { %1049 = vmax.xlane.f32.xlu1 %v1048_v17  ;;  %v1306_v59 = vpack.c.bf16 %v3180_v49, %v3173_v50  ;;  %2458 = vpow2.f32 %v1191_v60 }
 0x352   : > { %2460 = vpow2.f32 %v1193_v39 }
 0x354   : > { %v1026_v63 = vpop.xlane.xlu1 %1025 }
 0x355   : > { %v1109_v61 = vsub.f32 %v2962_v51, %v1026_v63  ;;  %v1110_v41 = vsub.f32 %v2964_v52, %v1026_v63 }
 0x357   : > { %v1195_v62 = vmul.f32 1.442695, %v1109_v61  ;;  %v1197_v13 = vmul.f32 1.442695, %v1110_v41  ;;  %v2459_v57 = vpop.eup %2458  ;;  %v3207_v41 = vpop.f32.mrf.mxu0 }
 0x358   : > { %v2461_v0 = vpop.eup %2460 }
 0x359   : > { %2462 = vpow2.f32 %v1195_v62  ;;  %998 = vmax.xlane.f32.xlu1 %v997_v44  ;;  %v3209_v62 = vpop.f32.mrf.mxu1 }
 0x35a   : > { %2464 = vpow2.f32 %v1197_v13 }
 0x35c   : > { %v1065_v12 = vpop.xlane.xlu1 %1064 }
 0x35d   : > { %v1135_v52 = vsub.f32 %v3043_v48, %v1065_v12  ;;  %v1136_v7 = vsub.f32 %v3045_v54, %v1065_v12  ;;  %v1081_v54 = vmax.f32 %v3199_v29, %v3201_v14 }
 0x35f   : > { %v2463_v51 = vpop.eup %2462  ;;  %v1247_v17 = vmul.f32 1.442695, %v1135_v52  ;;  %v1249_v2 = vmul.f32 1.442695, %v1136_v7 }
 0x360   : > { %v2465_v11 = vpop.eup %2464  ;;  %v1289_v43 = vpack.c.bf16 %v2463_v51, %v2459_v57  ;;  %v1084_v57 = vmax.f32 %v3207_v41, %v3209_v62 }
 0x361   : > { %1079 = vmax.xlane.f32.xlu1 %v1078_v1  ;;  %v1290_v40 = vpack.c.bf16 %v2465_v11, %v2461_v0  ;;  %2466 = vpow2.f32 %v1247_v17 }
 0x362   : > { %1319 = vmatpush.bf16.xpose.msra.mxu0 %v1289_v43  ;;  %2468 = vpow2.f32 %v1249_v2 }
 0x363   : > { %1342 = vmatpush.bf16.xpose.msra.mxu1 %v1290_v40 }
 0x364   : > { %v1068_v60 = vpop.xlane.xlu1 %1067 }
 0x365   : > { %v1137_v48 = vsub.f32 %v3050_v53, %v1068_v60  ;;  %v1138_v39 = vsub.f32 %v3052_v47, %v1068_v60 }
 0x367   : > { %v1251_v63 = vmul.f32 1.442695, %v1137_v48  ;;  %v1253_v61 = vmul.f32 1.442695, %v1138_v39  ;;  %v3211_v44 = vpop.eup %2466 }
 0x368   : > { %v3213_v53 = vpop.eup %2468 }
 0x369   : > { %2470 = vpow2.f32 %v1251_v63  ;;  %1082 = vmax.xlane.f32.xlu1 %v1081_v54 }
 0x36a   : > { %2472 = vpow2.f32 %v1253_v61 }
 0x36c   : > { %v1017_v13 = vpop.xlane.xlu1 %1016 }
 0x36d   : > { %v1103_v12 = vsub.f32 %v2946_v34, %v1017_v13  ;;  %v1104_v51 = vsub.f32 %v2948_v9, %v1017_v13  ;;  %v1000_v9 = vmax.f32 %v2922_v19, %v2924_v20 }
 0x36f   : > { %v3215_v47 = vpop.eup %2470  ;;  %v1183_v11 = vmul.f32 1.442695, %v1103_v12  ;;  %v1185_v7 = vmul.f32 1.442695, %v1104_v51 }
 0x370   : > { %v3220_v0 = vpop.eup %2472  ;;  %v1303_v52 = vpack.c.bf16 %v3215_v47, %v3211_v44 }
 0x371   : > { %1085 = vmax.xlane.f32.xlu1 %v1084_v57  ;;  %v1304_v1 = vpack.c.bf16 %v3220_v0, %v3213_v53  ;;  %2474 = vpow2.f32 %v1183_v11  ;;  %v3748_v0 = vld [vmem:[#allocation5_spill] sm:$0xff] }
 0x372   : > { %2476 = vpow2.f32 %v1185_v7 }
 0x374   : > { %v1020_v43 = vpop.xlane.xlu1 %1019 }
 0x375   : > { %v1105_v40 = vsub.f32 %v2952_v36, %v1020_v43  ;;  %v1106_v34 = vsub.f32 %v2954_v37, %v1020_v43  ;;  %v1039_v36 = vmax.f32 %v2990_v5, %v2992_v6 }
 0x377   : > { %v1187_v17 = vmul.f32 1.442695, %v1105_v40  ;;  %v1189_v2 = vmul.f32 1.442695, %v1106_v34  ;;  %v2475_v48 = vpop.eup %2474  ;;  %v3740_v34 = vld [vmem:[#allocation18_spill] sm:$0xff] }
 0x378   : > { %v2477_v39 = vpop.eup %2476 }
 0x379   : > { %2478 = vpow2.f32 %v1187_v17  ;;  %1001 = vmax.xlane.f32.xlu1 %v1000_v9  ;;  %v3741_v17 = vld [vmem:[#allocation17_spill] sm:$0xff] }
 0x37a   : > { %2480 = vpow2.f32 %v1189_v2  ;;  %v1042_v2 = vmax.f32 %v3741_v17, %v3740_v34 }
 0x37c   : > { %v1059_v60 = vpop.xlane.xlu1 %1058 }
 0x37d   : > { %v1131_v61 = vsub.f32 %v3027_v55, %v1059_v60  ;;  %v1132_v54 = vsub.f32 %v3029_v56, %v1059_v60 }
 0x37f   : > { %v2479_v63 = vpop.eup %2478  ;;  %v1239_v57 = vmul.f32 1.442695, %v1131_v61  ;;  %v1241_v51 = vmul.f32 1.442695, %v1132_v54 }
 0x380   : > { %v2481_v37 = vpop.eup %2480  ;;  %v1287_v13 = vpack.c.bf16 %v2479_v63, %v2475_v48 }
 0x381   : > { %1040 = vmax.xlane.f32.xlu1 %v1039_v36  ;;  %v1288_v12 = vpack.c.bf16 %v2481_v37, %v2477_v39  ;;  %2482 = vpow2.f32 %v1239_v57  ;;  %v3743_v39 = vld [vmem:[#allocation13_spill] sm:$0xff] }
 0x382   : > { %1320 = vmatpush.bf16.xpose.msra.mxu0 %v1287_v13  ;;  %2484 = vpow2.f32 %v1241_v51 }
 0x383   : > { %1343 = vmatpush.bf16.xpose.msra.mxu1 %v1288_v12 }
 0x384   : > { %v1062_v11 = vpop.xlane.xlu1 %1061 }
 0x385   : > { %v1133_v7 = vsub.f32 %v3034_v4, %v1062_v11  ;;  %v1134_v43 = vsub.f32 %v3036_v10, %v1062_v11  ;;  %v3742_v10 = vld [vmem:[#allocation14_spill] sm:$0xff] }
 0x386   : > { %v991_v63 = vmax.f32 %v3743_v39, %v3742_v10 }
 0x387   : > { %v1243_v55 = vmul.f32 1.442695, %v1133_v7  ;;  %v1245_v40 = vmul.f32 1.442695, %v1134_v43  ;;  %v3239_v9 = vpop.eup %2482 }
 0x388   : > { %v3241_v60 = vpop.eup %2484 }
 0x389   : > { %2486 = vpow2.f32 %v1243_v55  ;;  %1043 = vmax.xlane.f32.xlu1 %v1042_v2 }
 0x38a   : > { %2488 = vpow2.f32 %v1245_v40 }
 0x38c   : > { %v1011_v56 = vpop.xlane.xlu1 %1010 }
 0x38d   : > { %v1099_v4 = vsub.f32 %v2936_v27, %v1011_v56  ;;  %v1100_v36 = vsub.f32 %v2938_v28, %v1011_v56 }
 0x38f   : > { %v3243_v48 = vpop.eup %2486  ;;  %v1175_v13 = vmul.f32 1.442695, %v1099_v4  ;;  %v1177_v12 = vmul.f32 1.442695, %v1100_v36 }
 0x390   : > { %v3248_v61 = vpop.eup %2488  ;;  %v1301_v37 = vpack.c.bf16 %v3243_v48, %v3239_v9  ;;  %v3749_v48 = vld [vmem:[#allocation3_spill] sm:$0xff] }
 0x391   : > { %992 = vmax.xlane.f32.xlu1 %v991_v63  ;;  %v1302_v54 = vpack.c.bf16 %v3248_v61, %v3241_v60  ;;  %2490 = vpow2.f32 %v1175_v13 }
 0x392   : > { %2492 = vpow2.f32 %v1177_v12 }
 0x394   : > { %v1014_v57 = vpop.xlane.xlu1 %1013 }
 0x395   : > { %v1101_v51 = vsub.f32 %v2942_v31, %v1014_v57  ;;  %v1102_v27 = vsub.f32 %v2944_v32, %v1014_v57 }
 0x397   : > { %v1179_v11 = vmul.f32 1.442695, %v1101_v51  ;;  %v1181_v7 = vmul.f32 1.442695, %v1102_v27  ;;  %v2491_v43 = vpop.eup %2490 }
 0x398   : > { %v2493_v55 = vpop.eup %2492 }
 0x399   : > { %2494 = vpow2.f32 %v1179_v11 }
 0x39a   : > { %2496 = vpow2.f32 %v1181_v7 }
 0x39c   : > { %v1053_v28 = vpop.xlane.xlu1 %1052 }
 0x39d   : > { %v1127_v2 = vsub.f32 %v3013_v30, %v1053_v28  ;;  %v1128_v4 = vsub.f32 %v3015_v33, %v1053_v28  ;;  %v371_v30 = vld [vmem:[%s3709_s2 + $0x40] sm:$0xff] }
 0x39f   : > { %v2495_v40 = vpop.eup %2494  ;;  %v1231_v31 = vmul.f32 1.442695, %v1127_v2  ;;  %v1233_v32 = vmul.f32 1.442695, %v1128_v4 }
 0x3a0   : > { %v2497_v56 = vpop.eup %2496  ;;  %v1285_v63 = vpack.c.bf16 %v2495_v40, %v2491_v43 }
 0x3a1   : > { %v1286_v36 = vpack.c.bf16 %v2497_v56, %v2493_v55  ;;  %2498 = vpow2.f32 %v1231_v31 }
 0x3a2   : > { %1321 = vmatpush.bf16.xpose.msra.mxu0 %v1285_v63  ;;  %2500 = vpow2.f32 %v1233_v32 }
 0x3a3   : > { %1344 = vmatpush.bf16.xpose.msra.mxu1 %v1286_v36 }
 0x3a4   : > { %v1056_v13 = vpop.xlane.xlu1 %1055 }
 0x3a5   : > { %v1129_v12 = vsub.f32 %v3020_v38, %v1056_v13  ;;  %v1130_v57 = vsub.f32 %v3022_v45, %v1056_v13  ;;  %v375_v45 = vld [vmem:[%s3709_s2 + $0x60] sm:$0xff] }
 0x3a7   : > { %v1235_v51 = vmul.f32 1.442695, %v1129_v12  ;;  %v1237_v27 = vmul.f32 1.442695, %v1130_v57  ;;  %v3264_v11 = vpop.eup %2498 }
 0x3a8   : > { %v3266_v7 = vpop.eup %2500 }
 0x3a9   : > { %2502 = vpow2.f32 %v1235_v51 }
 0x3aa   : > { %2504 = vpow2.f32 %v1237_v27  ;;  %418 = vperm.xlu1 %2432, %v371_v30  }
 0x3ac   : > { %v1005_v33 = vpop.xlane.xlu1 %1004 }
 0x3ad   : > { %v1095_v38 = vsub.f32 %v2926_v21, %v1005_v33  ;;  %v1096_v55 = vsub.f32 %v2928_v22, %v1005_v33  ;;  %v1459_v22 = vld [vmem:[%s3711_s4 + $0x10] sm:$0xff] }
 0x3af   : > { %v3268_v28 = vpop.eup %2502  ;;  %v1167_v56 = vmul.f32 1.442695, %v1095_v38  ;;  %v1169_v4 = vmul.f32 1.442695, %v1096_v55 }
 0x3b0   : > { %v3274_v43 = vpop.eup %2504  ;;  %v1299_v40 = vpack.c.bf16 %v3268_v28, %v3264_v11 }
 0x3b1   : > { %v1300_v2 = vpack.c.bf16 %v3274_v43, %v3266_v7  ;;  %2506 = vpow2.f32 %v1167_v56 }
 0x3b2   : > { %438 = vperm.xlu1 %2432, %v375_v45   ;;  %2508 = vpow2.f32 %v1169_v4 }
 0x3b4   : > { %v1008_v63 = vpop.xlane.xlu1 %1007 }
 0x3b5   : > { %v1097_v21 = vsub.f32 %v2932_v25, %v1008_v63  ;;  %v1098_v36 = vsub.f32 %v2934_v26, %v1008_v63  ;;  %v1462_v25 = vld [vmem:[%s3711_s4 + $0x28] sm:$0xff] }
 0x3b7   : > { %v1171_v31 = vmul.f32 1.442695, %v1097_v21  ;;  %v1173_v32 = vmul.f32 1.442695, %v1098_v36  ;;  %v2507_v12 = vpop.eup %2506  ;;  %v1465_v36 = vld [vmem:[%s3711_s4 + $0x40] sm:$0xff] }
 0x3b8   : > { %v2509_v57 = vpop.eup %2508 }
 0x3b9   : > { %2510 = vpow2.f32 %v1171_v31 }
 0x3ba   : > { %2512 = vpow2.f32 %v1173_v32  ;;  %1501 = vperm.xlu1 %2432, %v1459_v22  }
 0x3bc   : > { %v1047_v13 = vpop.xlane.xlu1 %1046 }
 0x3bd   : > { %v1123_v27 = vsub.f32 %v3002_v18, %v1047_v13  ;;  %v1124_v30 = vsub.f32 %v3004_v23, %v1047_v13 }
 0x3bf   : > { %v2511_v51 = vpop.eup %2510  ;;  %v1223_v45 = vmul.f32 1.442695, %v1123_v27  ;;  %v1225_v55 = vmul.f32 1.442695, %v1124_v30  ;;  %v3318_v30 = vpop.f32.mrf.mxu2 }
 0x3c0   : > { %v2513_v26 = vpop.eup %2512  ;;  %v1283_v33 = vpack.c.bf16 %v2511_v51, %v2507_v12  ;;  %v1471_v51 = vld [vmem:[%s3711_s4 + $0x70] sm:$0xff] }
 0x3c1   : > { %v1284_v38 = vpack.c.bf16 %v2513_v26, %v2509_v57  ;;  %2514 = vpow2.f32 %v1223_v45  ;;  %v1474_v26 = vld [vmem:[%s3711_s4 + $0x88] sm:$0xff]  ;;  %v3321_v45 = vpop.f32.mrf.mxu3 }
 0x3c2   : > { %1322 = vmatpush.bf16.xpose.msra.mxu0 %v1283_v33  ;;  %1516 = vperm.xlu1 %2432, %v1462_v25   ;;  %2516 = vpow2.f32 %v1225_v55 }
 0x3c3   : > { %1345 = vmatpush.bf16.xpose.msra.mxu1 %v1284_v38  ;;  %v1077_v38 = vpop.xlane.xlu0 %1076 }
 0x3c4   : > { %v1050_v56 = vpop.xlane.xlu1 %1049 }
 0x3c5   : > { %v1125_v4 = vsub.f32 %v3006_v24, %v1050_v56  ;;  %v1126_v63 = vsub.f32 %v3008_v3, %v1050_v56  ;;  %v1468_v24 = vld [vmem:[%s3711_s4 + $0x58] sm:$0xff]  ;;  %v3744_v56 = vld [vmem:[#allocation19_spill] sm:$0xff] }
 0x3c7   : > { %v1227_v18 = vmul.f32 1.442695, %v1125_v4  ;;  %v1229_v21 = vmul.f32 1.442695, %v1126_v63  ;;  %v3296_v31 = vpop.eup %2514  ;;  %v1143_v4 = vsub.f32 %v3744_v56, %v1077_v38 }
 0x3c8   : > { %v3298_v32 = vpop.eup %2516 }
 0x3c9   : > { %2518 = vpow2.f32 %v1227_v18 }
 0x3ca   : > { %2520 = vpow2.f32 %v1229_v21  ;;  %1531 = vperm.xlu1 %2432, %v1465_v36  }
 0x3cb   : > { %v424_v44 = vpop.permute.xlu0 %423 }
 0x3cc   : > { %v999_v23 = vpop.xlane.xlu1 %998 }
 0x3cd   : > { %v1091_v21 = vsub.f32 %v2916_v15, %v999_v23 }
 0x3cf   : > { %v3300_v22 = vpop.eup %2518  ;;  %v1159_v15 = vmul.f32 1.442695, %v1091_v21 }
 0x3d0   : > { %v3305_v3 = vpop.eup %2520  ;;  %v1297_v13 = vpack.c.bf16 %v3300_v22, %v3296_v31  ;;  %v3753_v31 = vld [vmem:[#allocation7_spill] sm:$0xff] }
 0x3d1   : > { %v1298_v12 = vpack.c.bf16 %v3305_v3, %v3298_v32  ;;  %v3754_v32 = vld [vmem:[#allocation10_spill] sm:$0xff] }
 0x3d2   : > { %1546 = vperm.xlu1 %2432, %v1468_v24   ;;  %v1092_v24 = vsub.f32 %v2918_v16, %v999_v23 }
 0x3d4   : > { %v1080_v57 = vpop.xlane.xlu1 %1079  ;;  %v1161_v16 = vmul.f32 1.442695, %v1092_v24  ;;  %v1480_v24 = vld [vmem:[%s3711_s4 + $0xb8] sm:$0xff] }
 0x3da   : > { %1561 = vperm.xlu1 %2432, %v1471_v51   ;;  %v1145_v51 = vsub.f32 %v3189_v42, %v1080_v57 }
 0x3dc   : > { %v1083_v27 = vpop.xlane.xlu1 %1082  ;;  %v1267_v42 = vmul.f32 1.442695, %v1145_v51 }
 0x3dd   : > { %v1147_v25 = vsub.f32 %v3199_v29, %v1083_v27  ;;  %v1148_v33 = vsub.f32 %v3201_v14, %v1083_v27 }
 0x3df   : > { %v1271_v55 = vmul.f32 1.442695, %v1147_v25  ;;  %v1273_v63 = vmul.f32 1.442695, %v1148_v33  ;;  %v1477_v25 = vld [vmem:[%s3711_s4 + $0xa0] sm:$0xff]  ;;  %v1146_v33 = vsub.f32 %v3193_v8, %v1080_v57 }
 0x3e1   : > { %2522 = vpow2.f32 %v1271_v55  ;;  %v1269_v23 = vmul.f32 1.442695, %v1146_v33 }
 0x3e2   : > { %1576 = vperm.xlu1 %2432, %v1474_v26   ;;  %v1263_v26 = vmul.f32 1.442695, %v1143_v4  ;;  %2524 = vpow2.f32 %v1273_v63 }
 0x3e4   : > { %v1086_v18 = vpop.xlane.xlu1 %1085 }
 0x3e5   : > { %v1149_v29 = vsub.f32 %v3207_v41, %v1086_v18  ;;  %v1150_v36 = vsub.f32 %v3209_v62, %v1086_v18  ;;  %v3333_v41 = vpop.f32.mrf.mxu2  ;;  %v3745_v62 = vld [vmem:[#allocation20_spill] sm:$0xff] }
 0x3e6   : > { %v1144_v56 = vsub.f32 %v3745_v62, %v1077_v38 }
 0x3e7   : > { %v1275_v14 = vmul.f32 1.442695, %v1149_v29  ;;  %v1277_v27 = vmul.f32 1.442695, %v1150_v36  ;;  %v2523_v18 = vpop.eup %2522  ;;  %v3336_v29 = vpop.f32.mrf.mxu3 }
 0x3e8   : > { %v2525_v4 = vpop.eup %2524  ;;  %v1265_v63 = vmul.f32 1.442695, %v1144_v56 }
 0x3e9   : > { %2526 = vpow2.f32 %v1275_v14 }
 0x3ea   : > { %2528 = vpow2.f32 %v1277_v27  ;;  %1591 = vperm.xlu1 %2432, %v1477_v25  }
 0x3eb   : > { %2530 = vpow2.f32 %v1263_v26 }
 0x3ec   : > { %v1002_v55 = vpop.xlane.xlu1 %1001  ;;  %2532 = vpow2.f32 %v1159_v15 }
 0x3ed   : > { %v1093_v8 = vsub.f32 %v2922_v19, %v1002_v55  ;;  %v1094_v57 = vsub.f32 %v2924_v20, %v1002_v55  ;;  %2534 = vpow2.f32 %v1161_v16  ;;  %v3343_v26 = vpop.f32.mrf.mxu2 }
 0x3ee   : > { %2536 = vpow2.f32 %v1267_v42  ;;  %v1483_v42 = vld [vmem:[%s3711_s4 + $0xd0] sm:$0xff] }
 0x3ef   : > { %v2527_v21 = vpop.eup %2526  ;;  %v1163_v38 = vmul.f32 1.442695, %v1093_v8  ;;  %v1165_v36 = vmul.f32 1.442695, %v1094_v57  ;;  %2538 = vpow2.f32 %v1269_v23  ;;  %v3347_v16 = vpop.f32.mrf.mxu3 }
 0x3f0   : > { %v2529_v51 = vpop.eup %2528  ;;  %v1309_v14 = vpack.c.bf16 %v2527_v21, %v2523_v18 }
 0x3f1   : > { %2540 = vpow2.f32 %v1163_v38  ;;  %v1310_v27 = vpack.c.bf16 %v2529_v51, %v2525_v4  ;;  %v2531_v25 = vpop.eup %2530 }
 0x3f2   : > { %2542 = vpow2.f32 %v1165_v36  ;;  %1606 = vperm.xlu1 %2432, %v1480_v24   ;;  %1363 = vmatpush.bf16.xpose.msrb.mxu2 %v1309_v14  ;;  %v2533_v19 = vpop.eup %2532  ;;  %v3746_v36 = vld [vmem:[#allocation15_spill] sm:$0xff]  ;;  %v1486_v14 = vld [vmem:[%s3711_s4 + $0xe8] sm:$0xff] }
 0x3f3   : > { %2544 = vpow2.f32 %v1265_v63  ;;  %1386 = vmatpush.bf16.xpose.msrb.mxu3 %v1310_v27  ;;  %v2535_v20 = vpop.eup %2534  ;;  %v996_v63 = vpop.xlane.xlu2 %995  ;;  %v3747_v27 = vld [vmem:[#allocation16_spill] sm:$0xff] }
 0x3f4   : > { %v3345_v33 = vpop.xlane.xlu1 %1040  ;;  %v2537_v15 = vpop.eup %2536  ;;  %v1089_v24 = vsub.f32 %v3746_v36, %v996_v63 }
 0x3f5   : > { %v2539_v62 = vpop.eup %2538  ;;  %v1307_v57 = vpack.c.bf16 %v2537_v15, %v2531_v25  ;;  %v3352_v21 = vpop.f32.mrf.mxu2  ;;  %v1090_v25 = vsub.f32 %v3747_v27, %v996_v63  ;;  %v1120_v9 = vsub.f32 %v2992_v6, %v3345_v33  ;;  %v3752_v63 = vld [vmem:[#allocation9_spill] sm:$0xff]  ;;  %v3755_v27 = vld [vmem:[#allocation8_spill] sm:$0xff] }
 0x3f7   : > { %v2541_v56 = vpop.eup %2540  ;;  %v3355_v51 = vpop.f32.mrf.mxu3 }
 0x3f8   : > { %v2543_v23 = vpop.eup %2542  ;;  %v1281_v55 = vpack.c.bf16 %v2541_v56, %v2533_v19  ;;  %v1155_v19 = vmul.f32 1.442695, %v1089_v24 }
 0x3f9   : > { %v2545_v18 = vpop.eup %2544  ;;  %v1282_v8 = vpack.c.bf16 %v2543_v23, %v2535_v20  ;;  %v1157_v20 = vmul.f32 1.442695, %v1090_v25 }
 0x3fa   : > { %1621 = vperm.xlu1 %2432, %v1483_v42   ;;  %1323 = vmatpush.bf16.xpose.msra.mxu0 %v1281_v55  ;;  %v1308_v4 = vpack.c.bf16 %v2539_v62, %v2545_v18  ;;  %2546 = vpow2.f32 %v1155_v19 }
 0x3fb   : > { %1346 = vmatpush.bf16.xpose.msra.mxu1 %v1282_v8  ;;  %1364 = vmatpush.bf16.xpose.msrb.mxu2 %v1307_v57  ;;  %2548 = vpow2.f32 %v1157_v20  ;;  %v626_v8 = vadd.f32 %v3333_v41, %v424_v44  ;;  %v3751_v57 = vld [vmem:[#allocation4_spill] sm:$0xff] }
 0x3fc   : > { %1387 = vmatpush.bf16.xpose.msrb.mxu3 %v1308_v4  ;;  %v1044_v38 = vpop.xlane.xlu1 %1043 }
 0x3fd   : > { %v3367_v62 = vpop.f32.mrf.mxu2  ;;  %v1121_v53 = vsub.f32 %v3741_v17, %v1044_v38  ;;  %v1122_v47 = vsub.f32 %v3740_v34, %v1044_v38  ;;  %v669_v6 = vadd.f32 %v3336_v29, %v626_v8  ;;  %v429_v29 = vpop.permute.xlu2 %428 }
 0x3fe   : > { %v543_v22 = vadd.f32 %v3753_v31, %v429_v29 }
 0x3ff   : > { %v3371_v18 = vpop.f32.mrf.mxu3  ;;  %v1219_v60 = vmul.f32 1.442695, %v1121_v53  ;;  %v1221_v17 = vmul.f32 1.442695, %v1122_v47 }
 0x400   : > { %v2547_v50 = vpop.eup %2546  ;;  %v586_v25 = vadd.f32 %v3755_v27, %v543_v22 }
 0x401   : > { %v2549_v46 = vpop.eup %2548 }
 0x402   : > { %1636 = vperm.xlu1 %2432, %v1486_v14  }
 0x403   : > { %1365 = vmatpush.bf16.xpose.msrb.mxu2 %v1305_v35 }
 0x404   : > { %1388 = vmatpush.bf16.xpose.msrb.mxu3 %v1306_v59  ;;  %v993_v15 = vpop.xlane.xlu1 %992 }
 0x405   : > { %v1087_v56 = vsub.f32 %v3743_v39, %v993_v15  ;;  %v1088_v42 = vsub.f32 %v3742_v10, %v993_v15  ;;  %v635_v58 = vpop.f32.mrf.mxu2 }
 0x407   : > { %v1151_v23 = vmul.f32 1.442695, %v1087_v56  ;;  %v1153_v55 = vmul.f32 1.442695, %v1088_v42  ;;  %v678_v35 = vpop.f32.mrf.mxu3  ;;  %v3756_v56 = vld [vmem:[#allocation11_spill] sm:$0xff] }
 0x409   : > { %2550 = vpow2.f32 %v1151_v23  ;;  %v3757_v23 = vld [vmem:[#allocation12_spill] sm:$0xff] }
 0x40a   : > { %2552 = vpow2.f32 %v1153_v55 }
 0x40b   : > { %1366 = vmatpush.bf16.xpose.msrb.mxu2 %v1303_v52  ;;  %v540_v52 = vadd.f32 %v3748_v0, %v424_v44  ;;  %2554 = vpow2.f32 %v1219_v60 }
 0x40c   : > { %1389 = vmatpush.bf16.xpose.msrb.mxu3 %v1304_v1  ;;  %v1119_v1 = vsub.f32 %v2990_v5, %v3345_v33  ;;  %v1217_v33 = vmul.f32 1.442695, %v1120_v9  ;;  %2556 = vpow2.f32 %v1221_v17 }
 0x40e   : > { %v1215_v41 = vmul.f32 1.442695, %v1119_v1 }
 0x40f   : > { %v2551_v49 = vpop.eup %2550 }
 0x410   : > { %v2553_v59 = vpop.eup %2552  ;;  %v1279_v10 = vpack.c.bf16 %v2547_v50, %v2551_v49  ;;  %2558 = vpow2.f32 %v1215_v41 }
 0x411   : > { %v1280_v39 = vpack.c.bf16 %v2549_v46, %v2553_v59  ;;  %2560 = vpow2.f32 %v1217_v33 }
 0x412   : > { %1324 = vmatpush.bf16.xpose.msra.mxu0 %v1279_v10 }
 0x413   : > { %1347 = vmatpush.bf16.xpose.msra.mxu1 %v1280_v39  ;;  %1367 = vmatpush.bf16.xpose.msrb.mxu2 %v1301_v37  ;;  %v3750_v37 = vld [vmem:[#allocation6_spill] sm:$0xff] }
 0x414   : > { %1390 = vmatpush.bf16.xpose.msrb.mxu3 %v1302_v54  ;;  %v583_v54 = vadd.f32 %v3750_v37, %v540_v52 }
 0x41b   : > { %1368 = vmatpush.bf16.xpose.msrb.mxu2 %v1299_v40  ;;  %v2555_v40 = vpop.eup %2554 }
 0x41c   : > { %1391 = vmatpush.bf16.xpose.msrb.mxu3 %v1300_v2  ;;  %v419_v34 = vpop.permute.xlu1 %418  ;;  %v434_v2 = vpop.permute.xlu0 %433 }
 0x41d   : > { %v538_v61 = vadd.f32 %v3749_v48, %v419_v34  ;;  %v624_v5 = vadd.f32 %v3318_v30, %v419_v34  ;;  %v2557_v30 = vpop.eup %2556  ;;  %v545_v38 = vadd.f32 %v3752_v63, %v434_v2  ;;  %v631_v24 = vadd.f32 %v3352_v21, %v434_v2 }
 0x41f   : > { %v581_v11 = vadd.f32 %v3751_v57, %v538_v61  ;;  %v667_v28 = vadd.f32 %v3321_v45, %v624_v5  ;;  %v2559_v45 = vpop.eup %2558  ;;  %v588_v3 = vadd.f32 %v3754_v32, %v545_v38 }
 0x420   : > { %v2561_v4 = vpop.eup %2560  ;;  %v1295_v36 = vpack.c.bf16 %v2555_v40, %v2559_v45  ;;  %v2405_v40 = vld [vmem:[%s3710_s3] sm:$0xff] }
 0x421   : > { %v1311_v7 = vpack.c.bf16 %v583_v54, %v581_v11  ;;  %v1312_v43 = vpack.c.bf16 %v669_v6, %v667_v28  ;;  %v1296_v14 = vpack.c.bf16 %v2557_v30, %v2561_v4  ;;  %v1313_v20 = vpack.c.bf16 %v588_v3, %v586_v25  ;;  %v2406_v3 = vld [vmem:[%s3710_s3 + $0x8] sm:$0xff] }
 0x423   : > { %1369 = vmatpush.bf16.xpose.msrb.mxu2 %v1297_v13  ;;  %1325 = vmatmul.bf16.vlgmr.msra.gmra.mxu0 %v1311_v7  ;;  %v629_v13 = vadd.f32 %v3343_v26, %v429_v29 }
 0x424   : > { %1392 = vmatpush.bf16.xpose.msrb.mxu3 %v1298_v12  ;;  %1348 = vmatmul.bf16.vlgmr.msra.gmra.mxu1 %v1312_v43  ;;  %v674_v12 = vadd.f32 %v3355_v51, %v631_v24  ;;  %v439_v21 = vpop.permute.xlu1 %438 }
 0x425   : > { %v672_v19 = vadd.f32 %v3347_v16, %v629_v13  ;;  %v548_v42 = vadd.f32 %v3756_v56, %v439_v21  ;;  %v634_v26 = vadd.f32 %v3367_v62, %v439_v21  ;;  %v2410_v21 = vld [vmem:[%s3710_s3 + $0x28] sm:$0xff]  ;;  %v2411_v56 = vld [vmem:[%s3710_s3 + $0x30] sm:$0xff] }
 0x427   : > { %v1314_v15 = vpack.c.bf16 %v674_v12, %v672_v19  ;;  %v591_v55 = vadd.f32 %v3757_v23, %v548_v42  ;;  %v677_v58 = vadd.f32 %v3371_v18, %v634_v26  ;;  %v2407_v19 = vld [vmem:[%s3710_s3 + $0x10] sm:$0xff]  ;;  %v2412_v42 = vld [vmem:[%s3710_s3 + $0x38] sm:$0xff]  ;;  %v2413_v26 = vld [vmem:[%s3710_s3 + $0x40] sm:$0xff]  ;;  %v1492_v23 = vpop.permute.xlu0 %1491 }
 0x429   : > { %v1315_v51 = vpack.c.bf16 %v591_v55, %v591_v55  ;;  %v1316_v50 = vpack.c.bf16 %v677_v58, %v677_v58  ;;  %v3466_v58 = vstv %s1955_s13 }
 0x42b   : > { %1370 = vmatpush.bf16.xpose.msrb.mxu2 %v1295_v36 }
 0x42c   : > { %1393 = vmatpush.bf16.xpose.msrb.mxu3 %v1296_v14 }
 0x432   : > { %1371 = vmatmul.bf16.vlgmr.msrb.gmra.mxu2 %v1311_v7 }
 0x433   : > { %1394 = vmatmul.bf16.vlgmr.msrb.gmra.mxu3 %v1312_v43  ;;  %1330 = vmatmul.bf16.gmra.mxu0 %v1313_v20 }
 0x434   : > { %1353 = vmatmul.bf16.gmra.mxu1 %v1314_v15 }
 0x442   : > { %1376 = vmatmul.bf16.gmra.mxu2 %v1313_v20  ;;  %v2408_v20 = vld [vmem:[%s3710_s3 + $0x18] sm:$0xff] }
 0x443   : > { %1399 = vmatmul.bf16.gmra.mxu3 %v1314_v15  ;;  %1335 = vmatmul.bf16.gmra.mxu0 %v1315_v51  ;;  %v2409_v15 = vld [vmem:[%s3710_s3 + $0x20] sm:$0xff] }
 0x444   : > { %1358 = vmatmul.bf16.gmra.mxu1 %v1316_v50 }
 0x452   : > { %1381 = vmatmul.bf16.gmra.mxu2 %v1315_v51 }
 0x453   : > { %1404 = vmatmul.bf16.gmra.mxu3 %v1316_v50 }
 0x4a0   : > { %v1326_v16 = vpop.f32.mrf.mxu0 }
 0x4a1   : > { %v1349_v46 = vpop.f32.mrf.mxu1 }
 0x4a2   : > { %v1350_v37 = vadd.f32 %v1349_v46, %v1326_v16  ;;  %v2566_v16 = vld [vmem:[%s2696_s29] sm:$0xff] }
 0x4a8   : > { %v1328_v49 = vpop.f32.mrf.mxu0 }
 0x4a9   : > { %v1351_v35 = vpop.f32.mrf.mxu1 }
 0x4aa   : > { %v1352_v54 = vadd.f32 %v1351_v35, %v1328_v49  ;;  %v1497_v49 = vpop.permute.xlu2 %1496 }
 0x4b0   : > { %v1331_v59 = vpop.f32.mrf.mxu0 }
 0x4b1   : > { %v1354_v10 = vpop.f32.mrf.mxu1 }
 0x4b2   : > { %v1355_v48 = vadd.f32 %v1354_v10, %v1331_v59  ;;  %v2414_v10 = vld [vmem:[%s3710_s3 + $0x48] sm:$0xff] }
 0x4b5   : > { %v1372_v39 = vpop.f32.mrf.mxu2 }
 0x4b6   : > { %v1395_v62 = vpop.f32.mrf.mxu3 }
 0x4b7   : > { %v1396_v14 = vadd.f32 %v1395_v62, %v1372_v39  ;;  %v2567_v62 = vld [vmem:[%s2696_s29 + $0x10] sm:$0xff] }
 0x4b8   : > { %v1333_v44 = vpop.f32.mrf.mxu0 }
 0x4b9   : > { %v1356_v53 = vpop.f32.mrf.mxu1 }
 0x4ba   : > { %v1357_v61 = vadd.f32 %v1356_v53, %v1333_v44  ;;  %v1502_v53 = vpop.permute.xlu1 %1501 }
 0x4bd   : > { %v1374_v47 = vpop.f32.mrf.mxu2 }
 0x4be   : > { %v1397_v18 = vpop.f32.mrf.mxu3 }
 0x4bf   : > { %v1398_v31 = vadd.f32 %v1397_v18, %v1374_v47 }
 0x4c0   : > { %v1336_v0 = vpop.f32.mrf.mxu0 }
 0x4c1   : > { %v1359_v52 = vpop.f32.mrf.mxu1 }
 0x4c2   : > { %v1360_v1 = vadd.f32 %v1359_v52, %v1336_v0  ;;  %v2568_v52 = vld [vmem:[%s2696_s29 + $0x20] sm:$0xff] }
 0x4c4   : > { %2562 = vrcp.f32 %v1360_v1 }
 0x4c5   : > { %v1377_v8 = vpop.f32.mrf.mxu2 }
 0x4c6   : > { %v1400_v9 = vpop.f32.mrf.mxu3 }
 0x4c7   : > { %v1401_v38 = vadd.f32 %v1400_v9, %v1377_v8 }
 0x4c8   : > { %v1338_v60 = vpop.f32.mrf.mxu0 }
 0x4c9   : > { %v1361_v34 = vpop.f32.mrf.mxu1  ;;  %v1507_v60 = vpop.permute.xlu0 %1506 }
 0x4ca   : > { %v2563_v17 = vpop.eup %2562 }
 0x4cb   : > { %v1411_v5 = vperm.slane %v2563_v17, 0 }
 0x4cd   : > { %v1379_v41 = vpop.f32.mrf.mxu2  ;;  %v1417_v6 = vmul.f32 %v1411_v5, %v1355_v48  ;;  %v1419_v33 = vmul.f32 %v1411_v5, %v1357_v61  ;;  %v1413_v28 = vmul.f32 %v1411_v5, %v1350_v37  ;;  %v1415_v7 = vmul.f32 %v1411_v5, %v1352_v54  ;;  %v2415_v61 = vld [vmem:[%s3710_s3 + $0x50] sm:$0xff]  ;;  %v2569_v5 = vld [vmem:[%s2696_s29 + $0x8] sm:$0xff] }
 0x4ce   : > { %v1402_v57 = vpop.f32.mrf.mxu3 }
 0x4cf   : > { %v1455_v11 = vpack.c.bf16 %v1419_v33, %v1417_v6  ;;  %v1453_v43 = vpack.c.bf16 %v1415_v7, %v1413_v28  ;;  %v1403_v36 = vadd.f32 %v1402_v57, %v1379_v41  ;;  %v2570_v41 = vld [vmem:[%s2696_s29 + $0x30] sm:$0xff] }
 0x4d1   : > { %1783 = vmatpush.bf16.msra.mxu2 %v1455_v11  ;;  %v1512_v11 = vpop.permute.xlu2 %1511 }
 0x4d5   : > { %v1382_v2 = vpop.f32.mrf.mxu2  ;;  %1784 = vmatpush.bf16.msra.mxu2 %v1453_v43 }
 0x4d6   : > { %v1405_v30 = vpop.f32.mrf.mxu3 }
 0x4d7   : > { %v1406_v45 = vadd.f32 %v1405_v30, %v1382_v2 }
 0x4d8   : > { %2357 = vmatmul.msk.bf16.vlgmr.msra.gmra.mxu2 %vm764_vm0, %v2405_v40 }
 0x4d9   : > { %2564 = vrcp.f32 %v1406_v45  ;;  %v2572_v45 = vld [vmem:[%s2696_s29 + $0x40] sm:$0xff] }
 0x4dd   : > { %v1384_v29 = vpop.f32.mrf.mxu2 }
 0x4de   : > { %v1407_v4 = vpop.f32.mrf.mxu3 }
 0x4df   : > { %v2565_v63 = vpop.eup %2564 }
 0x4e0   : > { %v1412_v24 = vperm.slane %v2565_v63, 0 }
 0x4e2   : > { %v1418_v22 = vmul.f32 %v1412_v24, %v1401_v38  ;;  %v1420_v13 = vmul.f32 %v1412_v24, %v1403_v36  ;;  %v1414_v12 = vmul.f32 %v1412_v24, %v1396_v14  ;;  %v1416_v27 = vmul.f32 %v1412_v24, %v1398_v31  ;;  %v1517_v38 = vpop.permute.xlu1 %1516  ;;  %v2416_v31 = vld [vmem:[%s3710_s3 + $0x58] sm:$0xff] }
 0x4e4   : > { %v1456_v32 = vpack.c.bf16 %v1420_v13, %v1418_v22  ;;  %v1454_v25 = vpack.c.bf16 %v1416_v27, %v1414_v12  ;;  %v2573_v22 = vld [vmem:[%s2696_s29 + $0x28] sm:$0xff] }
 0x4e6   : > { %1872 = vmatpush.bf16.msra.mxu3 %v1456_v32 }
 0x4e8   : > { %2358 = vmatmul.msk.bf16.gmra.mxu2 %vm764_vm0, %v2406_v3 }
 0x4ea   : > { %1873 = vmatpush.bf16.msra.mxu3 %v1454_v25 }
 0x4ed   : > { %2373 = vmatmul.msk.bf16.vlgmr.msra.gmra.mxu3 %vm764_vm0, %v2405_v40  ;;  %v2571_v40 = vld [vmem:[%s2696_s29 + $0x18] sm:$0xff] }
 0x4f8   : > { %2359 = vmatmul.msk.bf16.gmra.mxu2 %vm764_vm0, %v2407_v19 }
 0x4fd   : > { %2374 = vmatmul.msk.bf16.gmra.mxu3 %vm764_vm0, %v2406_v3  ;;  %v2574_v3 = vld [vmem:[%s2696_s29 + $0x50] sm:$0xff] }
 0x508   : > { %2360 = vmatmul.msk.bf16.gmra.mxu2 %vm764_vm0, %v2408_v20 }
 0x50d   : > { %2375 = vmatmul.msk.bf16.gmra.mxu3 %vm764_vm0, %v2407_v19  ;;  %v1522_v19 = vpop.permute.xlu0 %1521 }
 0x518   : > { %2361 = vmatmul.msk.bf16.gmra.mxu2 %vm764_vm0, %v2409_v15 }
 0x51d   : > { %2376 = vmatmul.msk.bf16.gmra.mxu3 %vm764_vm0, %v2408_v20 }
 0x528   : > { %2362 = vmatmul.msk.bf16.gmra.mxu2 %vm764_vm0, %v2410_v21 }
 0x52d   : > { %2377 = vmatmul.msk.bf16.gmra.mxu3 %vm764_vm0, %v2409_v15 }
 0x538   : > { %2363 = vmatmul.msk.bf16.gmra.mxu2 %vm764_vm0, %v2411_v56 }
 0x53d   : > { %2378 = vmatmul.msk.bf16.gmra.mxu3 %vm764_vm0, %v2410_v21 }
 0x548   : > { %2364 = vmatmul.msk.bf16.gmra.mxu2 %vm764_vm0, %v2412_v42 }
 0x54d   : > { %2379 = vmatmul.msk.bf16.gmra.mxu3 %vm764_vm0, %v2411_v56  ;;  %v2575_v56 = vld [vmem:[%s2696_s29 + $0x38] sm:$0xff] }
 0x558   : > { %2365 = vmatmul.msk.bf16.gmra.mxu2 %vm764_vm0, %v2413_v26 }
 0x55b   : > { %v1786_v55 = vpop.f32.mrf.mxu2 }
 0x55c   : > { %v1787_v51 = vadd.f32 %v1786_v55, %v1492_v23 }
 0x55d   : > { %2380 = vmatmul.msk.bf16.gmra.mxu3 %vm764_vm0, %v2412_v42 }
 0x55e   : > { %v1957_v50 = vmul.f32 %v3466_v58, %v1787_v51 }
 0x560   : > { %v2021_v46 = vadd.f32 %v2566_v16, %v1957_v50  ;;  %v1527_v16 = vpop.permute.xlu2 %1526 }
 0x562   : > { %2085 = vst [vmem:[%s3475_s18] sm:$0xff] %v2021_v46 }
 0x563   : > { %v1788_v35 = vpop.f32.mrf.mxu2 }
 0x564   : > { %v1789_v59 = vadd.f32 %v1788_v35, %v1497_v49 }
 0x566   : > { %v1959_v39 = vmul.f32 %v3466_v58, %v1789_v59  ;;  %v2417_v59 = vld [vmem:[%s3710_s3 + $0x60] sm:$0xff] }
 0x568   : > { %v2023_v44 = vadd.f32 %v2567_v62, %v1959_v39  ;;  %2366 = vmatmul.msk.bf16.gmra.mxu2 %vm764_vm0, %v2414_v10 }
 0x56a   : > { %2087 = vst [vmem:[%s3475_s18 + $0x10] sm:$0xff] %v2023_v44  ;;  %v2578_v44 = vld [vmem:[%s2696_s29 + $0x70] sm:$0xff] }
 0x56b   : > { %v1791_v47 = vpop.f32.mrf.mxu2 }
 0x56c   : > { %v1792_v18 = vadd.f32 %v1791_v47, %v1502_v53 }
 0x56d   : > { %2381 = vmatmul.msk.bf16.gmra.mxu3 %vm764_vm0, %v2413_v26 }
 0x56e   : > { %v1961_v0 = vmul.f32 %v3466_v58, %v1792_v18 }
 0x570   : > { %v2025_v1 = vadd.f32 %v2568_v52, %v1961_v0  ;;  %v1875_v8 = vpop.f32.mrf.mxu3  ;;  %v1532_v0 = vpop.permute.xlu1 %1531 }
 0x571   : > { %v1876_v9 = vadd.f32 %v1875_v8, %v1492_v23  ;;  %v2576_v23 = vld [vmem:[%s2696_s29 + $0x60] sm:$0xff] }
 0x572   : > { %2089 = vst [vmem:[%s3475_s18 + $0x20] sm:$0xff] %v2025_v1 }
 0x573   : > { %v1958_v34 = vmul.f32 %v3466_v58, %v1876_v9  ;;  %v1793_v17 = vpop.f32.mrf.mxu2  ;;  %v2579_v9 = vld [vmem:[%s2696_s29 + $0x58] sm:$0xff] }
 0x574   : > { %v1794_v48 = vadd.f32 %v1793_v17, %v1507_v60  ;;  %v2580_v17 = vld [vmem:[%s2696_s29 + $0x80] sm:$0xff] }
 0x575   : > { %v2022_v37 = vadd.f32 %v2569_v5, %v1958_v34 }
 0x576   : > { %v1963_v54 = vmul.f32 %v3466_v58, %v1794_v48 }
 0x577   : > { %2086 = vst [vmem:[%s3475_s18 + $0x8] sm:$0xff] %v2022_v37  ;;  %v1537_v37 = vpop.permute.xlu0 %1536 }
 0x578   : > { %v2027_v6 = vadd.f32 %v2570_v41, %v1963_v54  ;;  %v1877_v33 = vpop.f32.mrf.mxu3  ;;  %2367 = vmatmul.msk.bf16.gmra.mxu2 %vm764_vm0, %v2415_v61 }
 0x579   : > { %v1878_v57 = vadd.f32 %v1877_v33, %v1497_v49  ;;  %v2418_v33 = vld [vmem:[%s3710_s3 + $0x68] sm:$0xff] }
 0x57a   : > { %2091 = vst [vmem:[%s3475_s18 + $0x30] sm:$0xff] %v2027_v6 }
 0x57b   : > { %v1960_v28 = vmul.f32 %v3466_v58, %v1878_v57  ;;  %v1796_v7 = vpop.f32.mrf.mxu2  ;;  %v2581_v57 = vld [vmem:[%s2696_s29 + $0x68] sm:$0xff] }
 0x57c   : > { %v1797_v43 = vadd.f32 %v1796_v7, %v1512_v11  ;;  %v2582_v7 = vld [vmem:[%s2696_s29 + $0x90] sm:$0xff] }
 0x57d   : > { %v2024_v2 = vadd.f32 %v2571_v40, %v1960_v28  ;;  %2382 = vmatmul.msk.bf16.gmra.mxu3 %vm764_vm0, %v2414_v10  ;;  %v2577_v10 = vld [vmem:[%s2696_s29 + $0x48] sm:$0xff] }
 0x57e   : > { %v1965_v30 = vmul.f32 %v3466_v58, %v1797_v43 }
 0x57f   : > { %2088 = vst [vmem:[%s3475_s18 + $0x18] sm:$0xff] %v2024_v2 }
 0x580   : > { %v2029_v29 = vadd.f32 %v2572_v45, %v1965_v30  ;;  %v1880_v4 = vpop.f32.mrf.mxu3  ;;  %v1542_v30 = vpop.permute.xlu2 %1541 }
 0x581   : > { %v1881_v63 = vadd.f32 %v1880_v4, %v1502_v53 }
 0x582   : > { %2093 = vst [vmem:[%s3475_s18 + $0x40] sm:$0xff] %v2029_v29 }
 0x583   : > { %v1962_v36 = vmul.f32 %v3466_v58, %v1881_v63  ;;  %v1798_v24 = vpop.f32.mrf.mxu2  ;;  %v2583_v63 = vld [vmem:[%s2696_s29 + $0x78] sm:$0xff] }
 0x584   : > { %v1799_v14 = vadd.f32 %v1798_v24, %v1517_v38  ;;  %v2584_v24 = vld [vmem:[%s2696_s29 + $0xa0] sm:$0xff] }
 0x585   : > { %v2026_v13 = vadd.f32 %v2573_v22, %v1962_v36 }
 0x586   : > { %v1967_v32 = vmul.f32 %v3466_v58, %v1799_v14 }
 0x587   : > { %2090 = vst [vmem:[%s3475_s18 + $0x28] sm:$0xff] %v2026_v13  ;;  %v1547_v13 = vpop.permute.xlu1 %1546 }
 0x588   : > { %v2031_v12 = vadd.f32 %v2574_v3, %v1967_v32  ;;  %v1882_v27 = vpop.f32.mrf.mxu3  ;;  %2368 = vmatmul.msk.bf16.gmra.mxu2 %vm764_vm0, %v2416_v31 }
 0x589   : > { %v1883_v25 = vadd.f32 %v1882_v27, %v1507_v60  ;;  %v2419_v27 = vld [vmem:[%s3710_s3 + $0x70] sm:$0xff] }
 0x58a   : > { %2095 = vst [vmem:[%s3475_s18 + $0x50] sm:$0xff] %v2031_v12 }
 0x58b   : > { %v1964_v20 = vmul.f32 %v3466_v58, %v1883_v25  ;;  %v1801_v15 = vpop.f32.mrf.mxu2  ;;  %v2585_v25 = vld [vmem:[%s2696_s29 + $0x88] sm:$0xff] }
 0x58c   : > { %v1802_v21 = vadd.f32 %v1801_v15, %v1522_v19  ;;  %v2586_v15 = vld [vmem:[%s2696_s29 + $0xb0] sm:$0xff] }
 0x58d   : > { %v2028_v42 = vadd.f32 %v2575_v56, %v1964_v20  ;;  %2383 = vmatmul.msk.bf16.gmra.mxu3 %vm764_vm0, %v2415_v61 }
 0x58e   : > { %v1969_v26 = vmul.f32 %v3466_v58, %v1802_v21 }
 0x58f   : > { %2092 = vst [vmem:[%s3475_s18 + $0x38] sm:$0xff] %v2028_v42 }
 0x590   : > { %v2033_v55 = vadd.f32 %v2576_v23, %v1969_v26  ;;  %v1885_v51 = vpop.f32.mrf.mxu3  ;;  %v1552_v26 = vpop.permute.xlu0 %1551 }
 0x591   : > { %v1886_v50 = vadd.f32 %v1885_v51, %v1512_v11 }
 0x592   : > { %2097 = vst [vmem:[%s3475_s18 + $0x60] sm:$0xff] %v2033_v55 }
 0x593   : > { %v1966_v46 = vmul.f32 %v3466_v58, %v1886_v50  ;;  %v1803_v49 = vpop.f32.mrf.mxu2  ;;  %v2587_v50 = vld [vmem:[%s2696_s29 + $0x98] sm:$0xff] }
 0x594   : > { %v1804_v35 = vadd.f32 %v1803_v49, %v1527_v16  ;;  %v2588_v49 = vld [vmem:[%s2696_s29 + $0xc0] sm:$0xff] }
 0x595   : > { %v2030_v39 = vadd.f32 %v2577_v10, %v1966_v46 }
 0x596   : > { %v1971_v62 = vmul.f32 %v3466_v58, %v1804_v35 }
 0x597   : > { %2094 = vst [vmem:[%s3475_s18 + $0x48] sm:$0xff] %v2030_v39  ;;  %v1557_v39 = vpop.permute.xlu2 %1556 }
 0x598   : > { %v2035_v53 = vadd.f32 %v2578_v44, %v1971_v62  ;;  %v1887_v47 = vpop.f32.mrf.mxu3  ;;  %2369 = vmatmul.msk.bf16.gmra.mxu2 %vm764_vm0, %v2417_v59 }
 0x599   : > { %v1888_v18 = vadd.f32 %v1887_v47, %v1517_v38  ;;  %v2420_v47 = vld [vmem:[%s3710_s3 + $0x78] sm:$0xff] }
 0x59a   : > { %2099 = vst [vmem:[%s3475_s18 + $0x70] sm:$0xff] %v2035_v53 }
 0x59b   : > { %v1968_v52 = vmul.f32 %v3466_v58, %v1888_v18  ;;  %v1806_v1 = vpop.f32.mrf.mxu2  ;;  %v2589_v18 = vld [vmem:[%s2696_s29 + $0xa8] sm:$0xff] }
 0x59c   : > { %v1807_v8 = vadd.f32 %v1806_v1, %v1532_v0  ;;  %v2590_v1 = vld [vmem:[%s2696_s29 + $0xd0] sm:$0xff] }
 0x59d   : > { %v2032_v60 = vadd.f32 %v2579_v9, %v1968_v52  ;;  %2384 = vmatmul.msk.bf16.gmra.mxu3 %vm764_vm0, %v2416_v31 }
 0x59e   : > { %v1973_v34 = vmul.f32 %v3466_v58, %v1807_v8 }
 0x59f   : > { %2096 = vst [vmem:[%s3475_s18 + $0x58] sm:$0xff] %v2032_v60 }
 0x5a0   : > { %v2037_v48 = vadd.f32 %v2580_v17, %v1973_v34  ;;  %v1890_v61 = vpop.f32.mrf.mxu3  ;;  %v1562_v34 = vpop.permute.xlu1 %1561 }
 0x5a1   : > { %v1891_v5 = vadd.f32 %v1890_v61, %v1522_v19 }
 0x5a2   : > { %2101 = vst [vmem:[%s3475_s18 + $0x80] sm:$0xff] %v2037_v48 }
 0x5a3   : > { %v1970_v54 = vmul.f32 %v3466_v58, %v1891_v5  ;;  %v1808_v41 = vpop.f32.mrf.mxu2  ;;  %v2591_v5 = vld [vmem:[%s2696_s29 + $0xb8] sm:$0xff] }
 0x5a4   : > { %v1809_v6 = vadd.f32 %v1808_v41, %v1537_v37  ;;  %v2592_v41 = vld [vmem:[%s2696_s29 + $0xe0] sm:$0xff] }
 0x5a5   : > { %v2034_v11 = vadd.f32 %v2581_v57, %v1970_v54 }
 0x5a6   : > { %v1975_v28 = vmul.f32 %v3466_v58, %v1809_v6 }
 0x5a7   : > { %2098 = vst [vmem:[%s3475_s18 + $0x68] sm:$0xff] %v2034_v11  ;;  %v1567_v11 = vpop.permute.xlu0 %1566 }
 0x5a8   : > { %v2039_v43 = vadd.f32 %v2582_v7, %v1975_v28  ;;  %v1892_v40 = vpop.f32.mrf.mxu3  ;;  %2370 = vmatmul.msk.bf16.gmra.mxu2 %vm764_vm0, %v2418_v33 }
 0x5a9   : > { %v1893_v2 = vadd.f32 %v1892_v40, %v1527_v16  ;;  %v2593_v40 = vld [vmem:[%s2696_s29 + $0xc8] sm:$0xff] }
 0x5aa   : > { %2103 = vst [vmem:[%s3475_s18 + $0x90] sm:$0xff] %v2039_v43 }
 0x5ab   : > { %v1972_v45 = vmul.f32 %v3466_v58, %v1893_v2  ;;  %v1811_v29 = vpop.f32.mrf.mxu2 }
 0x5ac   : > { %v1812_v4 = vadd.f32 %v1811_v29, %v1542_v30 }
 0x5ad   : > { %v2036_v38 = vadd.f32 %v2583_v63, %v1972_v45  ;;  %2385 = vmatmul.msk.bf16.gmra.mxu3 %vm764_vm0, %v2417_v59  ;;  %v2594_v45 = vld [vmem:[%s2696_s29 + $0xf0] sm:$0xff] }
 0x5ae   : > { %v1977_v36 = vmul.f32 %v3466_v58, %v1812_v4 }
 0x5af   : > { %2100 = vst [vmem:[%s3475_s18 + $0x78] sm:$0xff] %v2036_v38  ;;  %v1572_v38 = vpop.permute.xlu2 %1571 }
 0x5b0   : > { %v2041_v14 = vadd.f32 %v2584_v24, %v1977_v36  ;;  %v1895_v31 = vpop.f32.mrf.mxu3 }
 0x5b1   : > { %v1896_v22 = vadd.f32 %v1895_v31, %v1532_v0  ;;  %v2595_v31 = vld [vmem:[%s2696_s29 + $0xd8] sm:$0xff] }
 0x5b2   : > { %2105 = vst [vmem:[%s3475_s18 + $0xa0] sm:$0xff] %v2041_v14 }
 0x5b3   : > { %v1974_v32 = vmul.f32 %v3466_v58, %v1896_v22  ;;  %v1813_v3 = vpop.f32.mrf.mxu2 }
 0x5b4   : > { %v1814_v12 = vadd.f32 %v1813_v3, %v1547_v13 }
 0x5b5   : > { %v2038_v19 = vadd.f32 %v2585_v25, %v1974_v32  ;;  %v2596_v32 = vld [vmem:[%s2696_s29 + $0x100] sm:$0xff]  ;;  %v1577_v25 = vpop.permute.xlu1 %1576 }
 0x5b6   : > { %v1979_v20 = vmul.f32 %v3466_v58, %v1814_v12 }
 0x5b7   : > { %2102 = vst [vmem:[%s3475_s18 + $0x88] sm:$0xff] %v2038_v19 }
 0x5b8   : > { %v2043_v21 = vadd.f32 %v2586_v15, %v1979_v20  ;;  %v1897_v56 = vpop.f32.mrf.mxu3  ;;  %2371 = vmatmul.msk.bf16.gmra.mxu2 %vm764_vm0, %v2419_v27 }
 0x5b9   : > { %v1898_v42 = vadd.f32 %v1897_v56, %v1537_v37 }
 0x5ba   : > { %2107 = vst [vmem:[%s3475_s18 + $0xb0] sm:$0xff] %v2043_v21  ;;  %v2597_v21 = vld [vmem:[%s2696_s29 + $0xe8] sm:$0xff] }
 0x5bb   : > { %v1976_v23 = vmul.f32 %v3466_v58, %v1898_v42  ;;  %v1816_v55 = vpop.f32.mrf.mxu2 }
 0x5bc   : > { %v1817_v51 = vadd.f32 %v1816_v55, %v1552_v26 }
 0x5bd   : > { %v2040_v16 = vadd.f32 %v2587_v50, %v1976_v23  ;;  %2386 = vmatmul.msk.bf16.gmra.mxu3 %vm764_vm0, %v2418_v33  ;;  %v1582_v50 = vpop.permute.xlu0 %1581 }
 0x5be   : > { %v1981_v46 = vmul.f32 %v3466_v58, %v1817_v51 }
 0x5bf   : > { %2104 = vst [vmem:[%s3475_s18 + $0x98] sm:$0xff] %v2040_v16 }
 0x5c0   : > { %v2045_v35 = vadd.f32 %v2588_v49, %v1981_v46  ;;  %v1900_v59 = vpop.f32.mrf.mxu3 }
 0x5c1   : > { %v1901_v10 = vadd.f32 %v1900_v59, %v1542_v30 }
 0x5c2   : > { %2109 = vst [vmem:[%s3475_s18 + $0xc0] sm:$0xff] %v2045_v35  ;;  %v2599_v35 = vld [vmem:[%s2696_s29 + $0xf8] sm:$0xff] }
 0x5c3   : > { %v1978_v62 = vmul.f32 %v3466_v58, %v1901_v10  ;;  %v1818_v44 = vpop.f32.mrf.mxu2 }
 0x5c4   : > { %v1819_v53 = vadd.f32 %v1818_v44, %v1557_v39 }
 0x5c5   : > { %v2042_v0 = vadd.f32 %v2589_v18, %v1978_v62 }
 0x5c6   : > { %v1983_v52 = vmul.f32 %v3466_v58, %v1819_v53 }
 0x5c7   : > { %2106 = vst [vmem:[%s3475_s18 + $0xa8] sm:$0xff] %v2042_v0 }
 0x5c8   : > { %v2047_v8 = vadd.f32 %v2590_v1, %v1983_v52  ;;  %v1902_v9 = vpop.f32.mrf.mxu3  ;;  %2372 = vmatmul.msk.bf16.gmra.mxu2 %vm764_vm0, %v2420_v47  ;;  %v2601_v1 = vld [vmem:[%s2696_s29 + $0x108] sm:$0xff] }
 0x5c9   : > { %v1903_v60 = vadd.f32 %v1902_v9, %v1547_v13 }
 0x5ca   : > { %2111 = vst [vmem:[%s3475_s18 + $0xd0] sm:$0xff] %v2047_v8 }
 0x5cb   : > { %v1980_v17 = vmul.f32 %v3466_v58, %v1903_v60  ;;  %v1821_v48 = vpop.f32.mrf.mxu2  ;;  %v2602_v60 = vld [vmem:[%s2696_s29 + $0x130] sm:$0xff] }
 0x5cc   : > { %v1822_v61 = vadd.f32 %v1821_v48, %v1562_v34 }
 0x5cd   : > { %v2044_v37 = vadd.f32 %v2591_v5, %v1980_v17  ;;  %2387 = vmatmul.msk.bf16.gmra.mxu3 %vm764_vm0, %v2419_v27 }
 0x5ce   : > { %v1985_v54 = vmul.f32 %v3466_v58, %v1822_v61  ;;  %v1592_v61 = vpop.permute.xlu1 %1591 }
 0x5cf   : > { %2108 = vst [vmem:[%s3475_s18 + $0xb8] sm:$0xff] %v2044_v37 }
 0x5d0   : > { %v2049_v6 = vadd.f32 %v2592_v41, %v1985_v54  ;;  %v1905_v33 = vpop.f32.mrf.mxu3  ;;  %v2603_v41 = vld [vmem:[%s2696_s29 + $0x118] sm:$0xff] }
 0x5d1   : > { %v1906_v57 = vadd.f32 %v1905_v33, %v1552_v26  ;;  %v2598_v26 = vld [vmem:[%s2696_s29 + $0x110] sm:$0xff] }
 0x5d2   : > { %2113 = vst [vmem:[%s3475_s18 + $0xe0] sm:$0xff] %v2049_v6 }
 0x5d3   : > { %v1982_v28 = vmul.f32 %v3466_v58, %v1906_v57  ;;  %v1823_v7 = vpop.f32.mrf.mxu2  ;;  %v2604_v57 = vld [vmem:[%s2696_s29 + $0x140] sm:$0xff] }
 0x5d4   : > { %v1824_v43 = vadd.f32 %v1823_v7, %v1567_v11 }
 0x5d5   : > { %v2046_v2 = vadd.f32 %v2593_v40, %v1982_v28 }
 0x5d6   : > { %v1987_v30 = vmul.f32 %v3466_v58, %v1824_v43  ;;  %v1597_v43 = vpop.permute.xlu0 %1596 }
 0x5d7   : > { %2110 = vst [vmem:[%s3475_s18 + $0xc8] sm:$0xff] %v2046_v2 }
 0x5d8   : > { %v2051_v29 = vadd.f32 %v2594_v45, %v1987_v30  ;;  %v1907_v4 = vpop.f32.mrf.mxu3  ;;  %v2605_v45 = vld [vmem:[%s2696_s29 + $0x128] sm:$0xff] }
 0x5d9   : > { %v1908_v63 = vadd.f32 %v1907_v4, %v1557_v39  ;;  %v2600_v39 = vld [vmem:[%s2696_s29 + $0x120] sm:$0xff] }
 0x5da   : > { %2115 = vst [vmem:[%s3475_s18 + $0xf0] sm:$0xff] %v2051_v29 }
 0x5db   : > { %v1984_v36 = vmul.f32 %v3466_v58, %v1908_v63  ;;  %v1826_v24 = vpop.f32.mrf.mxu2  ;;  %v2606_v63 = vld [vmem:[%s2696_s29 + $0x150] sm:$0xff] }
 0x5dc   : > { %v1827_v14 = vadd.f32 %v1826_v24, %v1572_v38 }
 0x5dd   : > { %v2048_v22 = vadd.f32 %v2595_v31, %v1984_v36  ;;  %2388 = vmatmul.msk.bf16.gmra.mxu3 %vm764_vm0, %v2420_v47  ;;  %v1587_v47 = vpop.permute.xlu2 %1586 }
 0x5de   : > { %v1989_v13 = vmul.f32 %v3466_v58, %v1827_v14 }
 0x5df   : > { %2112 = vst [vmem:[%s3475_s18 + $0xd8] sm:$0xff] %v2048_v22 }
 0x5e0   : > { %v2053_v3 = vadd.f32 %v2596_v32, %v1989_v13  ;;  %v1910_v12 = vpop.f32.mrf.mxu3  ;;  %v2607_v32 = vld [vmem:[%s2696_s29 + $0x138] sm:$0xff] }
 0x5e1   : > { %v1911_v27 = vadd.f32 %v1910_v12, %v1562_v34 }
 0x5e2   : > { %2117 = vst [vmem:[%s3475_s18 + $0x100] sm:$0xff] %v2053_v3 }
 0x5e3   : > { %v1986_v19 = vmul.f32 %v3466_v58, %v1911_v27  ;;  %v1828_v20 = vpop.f32.mrf.mxu2  ;;  %v2608_v27 = vld [vmem:[%s2696_s29 + $0x160] sm:$0xff] }
 0x5e4   : > { %v1829_v15 = vadd.f32 %v1828_v20, %v1577_v25 }
 0x5e5   : > { %v2050_v56 = vadd.f32 %v2597_v21, %v1986_v19  ;;  %v1602_v14 = vpop.permute.xlu2 %1601 }
 0x5e6   : > { %v1991_v42 = vmul.f32 %v3466_v58, %v1829_v15  ;;  %v1607_v15 = vpop.permute.xlu1 %1606 }
 0x5e7   : > { %2114 = vst [vmem:[%s3475_s18 + $0xe8] sm:$0xff] %v2050_v56 }
 0x5e8   : > { %v2055_v23 = vadd.f32 %v2598_v26, %v1991_v42  ;;  %v1912_v55 = vpop.f32.mrf.mxu3  ;;  %v2609_v26 = vld [vmem:[%s2696_s29 + $0x148] sm:$0xff] }
 0x5e9   : > { %v1913_v51 = vadd.f32 %v1912_v55, %v1567_v11 }
 0x5ea   : > { %2119 = vst [vmem:[%s3475_s18 + $0x110] sm:$0xff] %v2055_v23 }
 0x5eb   : > { %v1988_v16 = vmul.f32 %v3466_v58, %v1913_v51  ;;  %v1831_v46 = vpop.f32.mrf.mxu2  ;;  %v2610_v51 = vld [vmem:[%s2696_s29 + $0x170] sm:$0xff] }
 0x5ec   : > { %v1832_v49 = vadd.f32 %v1831_v46, %v1582_v50 }
 0x5ed   : > { %v2052_v59 = vadd.f32 %v2599_v35, %v1988_v16 }
 0x5ee   : > { %v1993_v10 = vmul.f32 %v3466_v58, %v1832_v49  ;;  %v1612_v49 = vpop.permute.xlu0 %1611 }
 0x5ef   : > { %2116 = vst [vmem:[%s3475_s18 + $0xf8] sm:$0xff] %v2052_v59 }
 0x5f0   : > { %v2057_v62 = vadd.f32 %v2600_v39, %v1993_v10  ;;  %v1915_v44 = vpop.f32.mrf.mxu3  ;;  %v2611_v39 = vld [vmem:[%s2696_s29 + $0x158] sm:$0xff] }
 0x5f1   : > { %v1916_v53 = vadd.f32 %v1915_v44, %v1572_v38 }
 0x5f2   : > { %2121 = vst [vmem:[%s3475_s18 + $0x120] sm:$0xff] %v2057_v62 }
 0x5f3   : > { %v1990_v18 = vmul.f32 %v3466_v58, %v1916_v53  ;;  %v1833_v0 = vpop.f32.mrf.mxu2  ;;  %v2612_v53 = vld [vmem:[%s2696_s29 + $0x180] sm:$0xff] }
 0x5f4   : > { %v1834_v52 = vadd.f32 %v1833_v0, %v1587_v47 }
 0x5f5   : > { %v2054_v8 = vadd.f32 %v2601_v1, %v1990_v18 }
 0x5f6   : > { %v1995_v9 = vmul.f32 %v3466_v58, %v1834_v52  ;;  %v1617_v52 = vpop.permute.xlu2 %1616 }
 0x5f7   : > { %2118 = vst [vmem:[%s3475_s18 + $0x108] sm:$0xff] %v2054_v8 }
 0x5f8   : > { %v2059_v34 = vadd.f32 %v2602_v60, %v1995_v9  ;;  %v1917_v17 = vpop.f32.mrf.mxu3  ;;  %v2613_v60 = vld [vmem:[%s2696_s29 + $0x168] sm:$0xff] }
 0x5f9   : > { %v1918_v48 = vadd.f32 %v1917_v17, %v1577_v25 }
 0x5fa   : > { %2123 = vst [vmem:[%s3475_s18 + $0x130] sm:$0xff] %v2059_v34 }
 0x5fb   : > { %v1992_v5 = vmul.f32 %v3466_v58, %v1918_v48  ;;  %v1836_v37 = vpop.f32.mrf.mxu2  ;;  %v2614_v48 = vld [vmem:[%s2696_s29 + $0x190] sm:$0xff] }
 0x5fc   : > { %v1837_v54 = vadd.f32 %v1836_v37, %v1592_v61 }
 0x5fd   : > { %v2056_v6 = vadd.f32 %v2603_v41, %v1992_v5 }
 0x5fe   : > { %v1997_v33 = vmul.f32 %v3466_v58, %v1837_v54  ;;  %v1622_v54 = vpop.permute.xlu1 %1621 }
 0x5ff   : > { %2120 = vst [vmem:[%s3475_s18 + $0x118] sm:$0xff] %v2056_v6 }
 0x600   : > { %v2061_v11 = vadd.f32 %v2604_v57, %v1997_v33  ;;  %v1920_v28 = vpop.f32.mrf.mxu3  ;;  %v2615_v57 = vld [vmem:[%s2696_s29 + $0x178] sm:$0xff] }
 0x601   : > { %v1921_v7 = vadd.f32 %v1920_v28, %v1582_v50 }
 0x602   : > { %2125 = vst [vmem:[%s3475_s18 + $0x140] sm:$0xff] %v2061_v11 }
 0x603   : > { %v1994_v40 = vmul.f32 %v3466_v58, %v1921_v7  ;;  %v1838_v2 = vpop.f32.mrf.mxu2  ;;  %v2616_v7 = vld [vmem:[%s2696_s29 + $0x1a0] sm:$0xff] }
 0x604   : > { %v1839_v30 = vadd.f32 %v1838_v2, %v1597_v43 }
 0x605   : > { %v2058_v29 = vadd.f32 %v2605_v45, %v1994_v40 }
 0x606   : > { %v1999_v4 = vmul.f32 %v3466_v58, %v1839_v30  ;;  %v1627_v30 = vpop.permute.xlu0 %1626 }
 0x607   : > { %2122 = vst [vmem:[%s3475_s18 + $0x128] sm:$0xff] %v2058_v29 }
 0x608   : > { %v2063_v38 = vadd.f32 %v2606_v63, %v1999_v4  ;;  %v1922_v36 = vpop.f32.mrf.mxu3  ;;  %v2617_v63 = vld [vmem:[%s2696_s29 + $0x188] sm:$0xff] }
 0x609   : > { %v1923_v24 = vadd.f32 %v1922_v36, %v1587_v47 }
 0x60a   : > { %2127 = vst [vmem:[%s3475_s18 + $0x150] sm:$0xff] %v2063_v38 }
 0x60b   : > { %v1996_v31 = vmul.f32 %v3466_v58, %v1923_v24  ;;  %v1841_v22 = vpop.f32.mrf.mxu2  ;;  %v2618_v24 = vld [vmem:[%s2696_s29 + $0x1b0] sm:$0xff] }
 0x60c   : > { %v1842_v13 = vadd.f32 %v1841_v22, %v1602_v14 }
 0x60d   : > { %v2060_v3 = vadd.f32 %v2607_v32, %v1996_v31 }
 0x60e   : > { %v2001_v12 = vmul.f32 %v3466_v58, %v1842_v13  ;;  %v1632_v13 = vpop.permute.xlu2 %1631 }
 0x60f   : > { %2124 = vst [vmem:[%s3475_s18 + $0x138] sm:$0xff] %v2060_v3 }
 0x610   : > { %v2065_v25 = vadd.f32 %v2608_v27, %v2001_v12  ;;  %v1925_v19 = vpop.f32.mrf.mxu3  ;;  %v2619_v27 = vld [vmem:[%s2696_s29 + $0x198] sm:$0xff] }
 0x611   : > { %v1926_v20 = vadd.f32 %v1925_v19, %v1592_v61 }
 0x612   : > { %2129 = vst [vmem:[%s3475_s18 + $0x160] sm:$0xff] %v2065_v25 }
 0x613   : > { %v1998_v21 = vmul.f32 %v3466_v58, %v1926_v20  ;;  %v1843_v56 = vpop.f32.mrf.mxu2  ;;  %v2620_v20 = vld [vmem:[%s2696_s29 + $0x1c0] sm:$0xff] }
 0x614   : > { %v1844_v42 = vadd.f32 %v1843_v56, %v1607_v15 }
 0x615   : > { %v2062_v23 = vadd.f32 %v2609_v26, %v1998_v21 }
 0x616   : > { %v2003_v55 = vmul.f32 %v3466_v58, %v1844_v42  ;;  %v1637_v42 = vpop.permute.xlu1 %1636 }
 0x617   : > { %2126 = vst [vmem:[%s3475_s18 + $0x148] sm:$0xff] %v2062_v23 }
 0x618   : > { %v2067_v50 = vadd.f32 %v2610_v51, %v2003_v55  ;;  %v1927_v16 = vpop.f32.mrf.mxu3  ;;  %v2621_v51 = vld [vmem:[%s2696_s29 + $0x1a8] sm:$0xff] }
 0x619   : > { %v1928_v46 = vadd.f32 %v1927_v16, %v1597_v43 }
 0x61a   : > { %2131 = vst [vmem:[%s3475_s18 + $0x170] sm:$0xff] %v2067_v50 }
 0x61b   : > { %v2000_v35 = vmul.f32 %v3466_v58, %v1928_v46  ;;  %v1846_v59 = vpop.f32.mrf.mxu2  ;;  %v2622_v46 = vld [vmem:[%s2696_s29 + $0x1d0] sm:$0xff] }
 0x61c   : > { %v1847_v10 = vadd.f32 %v1846_v59, %v1612_v49 }
 0x61d   : > { %v2064_v62 = vadd.f32 %v2611_v39, %v2000_v35 }
 0x61e   : > { %v2005_v44 = vmul.f32 %v3466_v58, %v1847_v10  ;;  %v1642_v10 = vpop.permute.xlu0 %1641 }
 0x61f   : > { %2128 = vst [vmem:[%s3475_s18 + $0x158] sm:$0xff] %v2064_v62 }
 0x620   : > { %v2069_v47 = vadd.f32 %v2612_v53, %v2005_v44  ;;  %v1930_v18 = vpop.f32.mrf.mxu3  ;;  %v2623_v53 = vld [vmem:[%s2696_s29 + $0x1b8] sm:$0xff] }
 0x621   : > { %v1931_v0 = vadd.f32 %v1930_v18, %v1602_v14 }
 0x622   : > { %2133 = vst [vmem:[%s3475_s18 + $0x180] sm:$0xff] %v2069_v47 }
 0x623   : > { %v2002_v1 = vmul.f32 %v3466_v58, %v1931_v0  ;;  %v1848_v8 = vpop.f32.mrf.mxu2  ;;  %v2624_v0 = vld [vmem:[%s2696_s29 + $0x1e0] sm:$0xff] }
 0x624   : > { %v1849_v9 = vadd.f32 %v1848_v8, %v1617_v52 }
 0x625   : > { %v2066_v34 = vadd.f32 %v2613_v60, %v2002_v1 }
 0x626   : > { %v2007_v17 = vmul.f32 %v3466_v58, %v1849_v9  ;;  %v1647_v9 = vpop.permute.xlu2 %1646 }
 0x627   : > { %2130 = vst [vmem:[%s3475_s18 + $0x168] sm:$0xff] %v2066_v34 }
 0x628   : > { %v2071_v61 = vadd.f32 %v2614_v48, %v2007_v17  ;;  %v1932_v5 = vpop.f32.mrf.mxu3  ;;  %v2625_v48 = vld [vmem:[%s2696_s29 + $0x1c8] sm:$0xff] }
 0x629   : > { %v1933_v37 = vadd.f32 %v1932_v5, %v1607_v15 }
 0x62a   : > { %2135 = vst [vmem:[%s3475_s18 + $0x190] sm:$0xff] %v2071_v61 }
 0x62b   : > { %v2004_v41 = vmul.f32 %v3466_v58, %v1933_v37  ;;  %v1851_v6 = vpop.f32.mrf.mxu2  ;;  %v2626_v37 = vld [vmem:[%s2696_s29 + $0x1f0] sm:$0xff] }
 0x62c   : > { %v1852_v33 = vadd.f32 %v1851_v6, %v1622_v54 }
 0x62d   : > { %v2068_v11 = vadd.f32 %v2615_v57, %v2004_v41  ;;  %v2627_v57 = vld [vmem:[%s2696_s29 + $0x1d8] sm:$0xff] }
 0x62e   : > { %v2009_v28 = vmul.f32 %v3466_v58, %v1852_v33 }
 0x62f   : > { %2132 = vst [vmem:[%s3475_s18 + $0x178] sm:$0xff] %v2068_v11 }
 0x630   : > { %v2073_v43 = vadd.f32 %v2616_v7, %v2009_v28  ;;  %v1935_v40 = vpop.f32.mrf.mxu3 }
 0x631   : > { %v1936_v2 = vadd.f32 %v1935_v40, %v1612_v49  ;;  %v2628_v40 = vld [vmem:[%s2696_s29 + $0x1e8] sm:$0xff] }
 0x632   : > { %2137 = vst [vmem:[%s3475_s18 + $0x1a0] sm:$0xff] %v2073_v43 }
 0x633   : > { %v2006_v45 = vmul.f32 %v3466_v58, %v1936_v2  ;;  %v1853_v29 = vpop.f32.mrf.mxu2 }
 0x634   : > { %v1854_v4 = vadd.f32 %v1853_v29, %v1627_v30 }
 0x635   : > { %v2070_v38 = vadd.f32 %v2617_v63, %v2006_v45 }
 0x636   : > { %v2011_v36 = vmul.f32 %v3466_v58, %v1854_v4  ;;  %v2629_v4 = vld [vmem:[%s2696_s29 + $0x1f8] sm:$0xff] }
 0x637   : > { %2134 = vst [vmem:[%s3475_s18 + $0x188] sm:$0xff] %v2070_v38 }
 0x638   : > { %v2075_v14 = vadd.f32 %v2618_v24, %v2011_v36  ;;  %v1937_v31 = vpop.f32.mrf.mxu3 }
 0x639   : > { %v1938_v22 = vadd.f32 %v1937_v31, %v1617_v52 }
 0x63a   : > { %2139 = vst [vmem:[%s3475_s18 + $0x1b0] sm:$0xff] %v2075_v14 }
 0x63b   : > { %v2008_v32 = vmul.f32 %v3466_v58, %v1938_v22  ;;  %v1856_v3 = vpop.f32.mrf.mxu2 }
 0x63c   : > { %v1857_v12 = vadd.f32 %v1856_v3, %v1632_v13 }
 0x63d   : > { %v2072_v25 = vadd.f32 %v2619_v27, %v2008_v32 }
 0x63e   : > { %v2013_v19 = vmul.f32 %v3466_v58, %v1857_v12 }
 0x63f   : > { %2136 = vst [vmem:[%s3475_s18 + $0x198] sm:$0xff] %v2072_v25 }
 0x640   : > { %v2077_v15 = vadd.f32 %v2620_v20, %v2013_v19  ;;  %v1940_v21 = vpop.f32.mrf.mxu3 }
 0x641   : > { %v1941_v56 = vadd.f32 %v1940_v21, %v1622_v54 }
 0x642   : > { %2141 = vst [vmem:[%s3475_s18 + $0x1c0] sm:$0xff] %v2077_v15 }
 0x643   : > { %v2010_v26 = vmul.f32 %v3466_v58, %v1941_v56  ;;  %v1858_v23 = vpop.f32.mrf.mxu2 }
 0x644   : > { %v1859_v55 = vadd.f32 %v1858_v23, %v1637_v42 }
 0x645   : > { %v2074_v50 = vadd.f32 %v2621_v51, %v2010_v26 }
 0x646   : > { %v2015_v16 = vmul.f32 %v3466_v58, %v1859_v55 }
 0x647   : > { %2138 = vst [vmem:[%s3475_s18 + $0x1a8] sm:$0xff] %v2074_v50 }
 0x648   : > { %v2079_v49 = vadd.f32 %v2622_v46, %v2015_v16  ;;  %v1942_v35 = vpop.f32.mrf.mxu3 }
 0x649   : > { %v1943_v59 = vadd.f32 %v1942_v35, %v1627_v30 }
 0x64a   : > { %2143 = vst [vmem:[%s3475_s18 + $0x1d0] sm:$0xff] %v2079_v49 }
 0x64b   : > { %v2012_v39 = vmul.f32 %v3466_v58, %v1943_v59  ;;  %v1861_v62 = vpop.f32.mrf.mxu2 }
 0x64c   : > { %v1862_v44 = vadd.f32 %v1861_v62, %v1642_v10 }
 0x64d   : > { %v2076_v47 = vadd.f32 %v2623_v53, %v2012_v39 }
 0x64e   : > { %v2017_v18 = vmul.f32 %v3466_v58, %v1862_v44 }
 0x64f   : > { %2140 = vst [vmem:[%s3475_s18 + $0x1b8] sm:$0xff] %v2076_v47 }
 0x650   : > { %v2081_v52 = vadd.f32 %v2624_v0, %v2017_v18  ;;  %v1945_v1 = vpop.f32.mrf.mxu3 }
 0x651   : > { %v1946_v8 = vadd.f32 %v1945_v1, %v1632_v13 }
 0x652   : > { %2145 = vst [vmem:[%s3475_s18 + $0x1e0] sm:$0xff] %v2081_v52 }
 0x653   : > { %v2014_v60 = vmul.f32 %v3466_v58, %v1946_v8  ;;  %v1863_v34 = vpop.f32.mrf.mxu2 }
 0x654   : > { %v1864_v17 = vadd.f32 %v1863_v34, %v1647_v9 }
 0x655   : > { %v2078_v61 = vadd.f32 %v2625_v48, %v2014_v60 }
 0x656   : > { %v2019_v5 = vmul.f32 %v3466_v58, %v1864_v17 }
 0x657   : > { %2142 = vst [vmem:[%s3475_s18 + $0x1c8] sm:$0xff] %v2078_v61 }
 0x658   : > { %v2083_v54 = vadd.f32 %v2626_v37, %v2019_v5  ;;  %v1947_v41 = vpop.f32.mrf.mxu3 }
 0x659   : > { %v1948_v6 = vadd.f32 %v1947_v41, %v1637_v42 }
 0x65a   : > { %2147 = vst [vmem:[%s3475_s18 + $0x1f0] sm:$0xff] %v2083_v54 }
 0x65b   : > { %v2016_v33 = vmul.f32 %v3466_v58, %v1948_v6 }
 0x65d   : > { %v2080_v11 = vadd.f32 %v2627_v57, %v2016_v33 }
 0x65f   : > { %2144 = vst [vmem:[%s3475_s18 + $0x1d8] sm:$0xff] %v2080_v11 }
 0x660   : > { %v1950_v28 = vpop.f32.mrf.mxu3 }
 0x661   : > { %v1951_v7 = vadd.f32 %v1950_v28, %v1642_v10 }
 0x663   : > { %v2018_v43 = vmul.f32 %v3466_v58, %v1951_v7 }
 0x665   : > { %v2082_v2 = vadd.f32 %v2628_v40, %v2018_v43 }
 0x667   : > { %2146 = vst [vmem:[%s3475_s18 + $0x1e8] sm:$0xff] %v2082_v2 }
 0x668   : > { %v1952_v30 = vpop.f32.mrf.mxu3 }
 0x669   : > { %v1953_v45 = vadd.f32 %v1952_v30, %v1647_v9 }
 0x66b   : > { %v2020_v29 = vmul.f32 %v3466_v58, %v1953_v45 }
 0x66d   : > { %v2084_v63 = vadd.f32 %v2629_v4, %v2020_v29 }
 0x66f   : > { %2148 = vst [vmem:[%s3475_s18 + $0x1f8] sm:$0xff] %v2084_v63 }
 0x670 PF: > { %s17_s23 = sadd.s32 1, %s2636_s23  }
 0x671   : > { %p14_p4 = scmp.ge.s32.totalorder %s17_s23, 4  }
 0x673   :  { %16 = sbr.rel (!%p14_p4) target bundleno = 2 (0x2), region = 74 }

</bundles_post_ra>
